<compile_context>
chip_gen: v6e
topology: v6e:2x2x1
jax: 0.10.0
libtpu: 0.0.40
codegen_flags: <defaults>
</compile_context>

<pallas_src>
import functools

import jax
import jax.numpy as jnp
from jax.experimental import pallas as pl
from jax.experimental.pallas import tpu as pltpu

# Tile caps shared by weight prep (init) and the GEMM wrapper so pre-padded
# weights always match the kernel's tiling.
TM_CAP = 512     # row block (lets conv1 collapse to a single M block)
TN_CAP = 256     # output-channel block (matches 2x256^2 MXU on v6e/v7x)
TK_CAP = 2048    # contraction: single full-extent block at this model's sizes


def _round_up(x, m):
    return (x + m - 1) // m * m


def _pad_and_tile_k(k):
    """Padded K and K-tile.  Honors TK_CAP (fixes the old hard-coded 512)."""
    if k <= TK_CAP:
        kp = _round_up(k, 16)            # bf16 sublane packing = 16
        return kp, kp                    # single full-extent block
    tk = (TK_CAP // 128) * 128           # multi-block K must be 128-aligned
    return _round_up(k, tk), tk


def _pad_and_tile_n(n):
    """Padded N and N-tile.  N always a multiple of 128 -> lane-dense stores."""
    if n <= TN_CAP:
        np_ = _round_up(n, 128)
        return np_, np_
    return _round_up(n, TN_CAP), TN_CAP


# ----------------------------------------------------------------------------
# Fused GEMM + bias (+ReLU) + 2x2 max-pool kernel.
#   grid = (M blocks, N blocks, pool phases P, K blocks)
#   acc_ref  : f32 sum over K blocks
#   pmax_ref : f32 max over pool phases (P=1 => plain GEMM epilogue)
# ----------------------------------------------------------------------------
def _gemm_pool_kernel(x_ref, w_ref, b_ref, o_ref, acc_ref, pmax_ref, *, relu):
    p = pl.program_id(2)                 # pool-phase index (max-reduction)
    k = pl.program_id(3)                 # contraction block (sum-reduction)

    @pl.when(k == 0)
    def _init():
        acc_ref[...] = jnp.zeros_like(acc_ref)

    acc_ref[...] += jnp.dot(x_ref[...], w_ref[...],
                            preferred_element_type=jnp.float32)

    @pl.when(k == pl.num_programs(3) - 1)
    def _epilogue():
        y = acc_ref[...] + b_ref[...]            # bias add in f32
        if relu:
            y = jnp.maximum(y, 0.0)

        @pl.when(p == 0)
        def _first_phase():
            pmax_ref[...] = y

        @pl.when(p > 0)
        def _other_phases():
            pmax_ref[...] = jnp.maximum(pmax_ref[...], y)

        @pl.when(p == pl.num_programs(2) - 1)
        def _writeback():
            o_ref[...] = pmax_ref[...].astype(o_ref.dtype)


def fused_gemm(x, w_pad, b_pad, *, n_out, relu, out_dtype=jnp.bfloat16):
    """out[m, n] = max_p relu(x[p, m, :] @ w + b)[:, :n_out].

    x:     [P, M, K]  (P = 4 pool phases for conv+pool layers, P = 1 for fc)
    w_pad: [Kp, Np]   bf16, pre-padded at init (no per-call weight prep)
    b_pad: [1,  Np]   f32,  pre-padded at init
    """
    P, M, K = x.shape
    Kp, Np = w_pad.shape
    assert Kp >= K and Np >= n_out

    if M <= TM_CAP:
        tm = Mp = _round_up(M, 16)
    else:
        tm, Mp = TM_CAP, _round_up(M, TM_CAP)
    tk = Kp if Kp <= TK_CAP else (TK_CAP // 128) * 128
    tn = Np if Np <= TN_CAP else TN_CAP
    assert Mp % tm == 0 and Kp % tk == 0 and Np % tn == 0

    # Only the activation is padded per call; weights/bias were padded once.
    xp = jnp.pad(x.astype(jnp.bfloat16),
                 ((0, 0), (0, Mp - M), (0, Kp - K))).reshape(P * Mp, Kp)

    nmb = Mp // tm
    grid = (nmb, Np // tn, P, Kp // tk)

    out = pl.pallas_call(
        functools.partial(_gemm_pool_kernel, relu=relu),
        out_shape=jax.ShapeDtypeStruct((Mp, Np), out_dtype),
        grid_spec=pltpu.PrefetchScalarGridSpec(
            num_scalar_prefetch=0,
            grid=grid,
            in_specs=[
                pl.BlockSpec((tm, tk),
                             lambda i, j, p, k, nmb=nmb: (p * nmb + i, k)),
                pl.BlockSpec((tk, tn), lambda i, j, p, k: (k, j)),
                pl.BlockSpec((1, tn), lambda i, j, p, k: (0, j)),
            ],
            out_specs=pl.BlockSpec((tm, tn), lambda i, j, p, k: (i, j)),
            scratch_shapes=[pltpu.VMEM((tm, tn), jnp.float32),   # K accumulator
                            pltpu.VMEM((tm, tn), jnp.float32)],  # phase max
        ),
        compiler_params=pltpu.CompilerParams(
            dimension_semantics=("parallel", "parallel",
                                 "arbitrary", "arbitrary"),
            vmem_limit_bytes=32 * 1024 * 1024,
        ),
    )(xp, w_pad, b_pad)
    return out[:M, :n_out]


# ----------------------------------------------------------------------------
# Phase-major im2col for conv3x3(stride=1, pad=1) followed by 2x2/2 max-pool.
# ----------------------------------------------------------------------------
def _im2col3x3_pool_phased(x):
    """x: [N,H,W,C] NHWC (H, W even) -> patches [4, N*(H//2)*(W//2), 9*C].

    Phase axis enumerates the 2x2 pool-window offset (a,b); rows are
    (n, ho, wo) row-major; within a row taps are (dh,dw)-major, Cin-minor
    (matches the [9*Cin, Cout] weight layout)."""
    N, H, W, C = x.shape
    assert H % 2 == 0 and W % 2 == 0
    Ho, Wo = H // 2, W // 2
    xp = jnp.pad(x, ((0, 0), (1, 1), (1, 1), (0, 0)))
    phases = []
    for a in range(2):
        for b in range(2):
            taps = [xp[:, a + dh:a + dh + H:2, b + dw:b + dw + W:2, :]
                    for dh in range(3) for dw in range(3)]
            phases.append(jnp.stack(taps, axis=3).reshape(N * Ho * Wo, 9 * C))
    return jnp.stack(phases, axis=0)


# ----------------------------------------------------------------------------
# Forward pass: 3x (merged conv+relu+pool) -> fc1+relu -> fc2, all merged
# policy/value (block-diagonal weights).
# ----------------------------------------------------------------------------
def ppo_forward(x_nchw, params, *, hidden_dim, output_dim):
    """x: [N,3,H,W] f32 -> (action_logits [N, output_dim], value [N, 1])."""
    x = jnp.transpose(x_nchw, (0, 2, 3, 1)).astype(jnp.bfloat16)   # NCHW->NHWC
    B = x.shape[0]

    def conv_relu_pool(y, layer, c_out):
        Bn, Hn, Wn, _ = y.shape
        pats = _im2col3x3_pool_phased(y)
        out = fused_gemm(pats, layer["w"], layer["b"], n_out=c_out, relu=True)
        return out.reshape(Bn, Hn // 2, Wn // 2, c_out)

    # Channels [0:half) = policy branch, [half:) = value branch at each layer.
    y = conv_relu_pool(x, params["conv1"], 64)
    y = conv_relu_pool(y, params["conv2"], 128)
    y = conv_relu_pool(y, params["conv3"], 256)

    feat = y.reshape(B, -1)                                         # NHWC flatten
    h = fused_gemm(feat[None], params["fc1"]["w"], params["fc1"]["b"],
                   n_out=2 * hidden_dim, relu=True)
    out = fused_gemm(h[None], params["fc2"]["w"], params["fc2"]["b"],
                     n_out=output_dim + 1, relu=False, out_dtype=jnp.float32)
    return out[:, :output_dim], out[:, output_dim:output_dim + 1]


# ----------------------------------------------------------------------------
# Parameter construction: per-branch weights merged block-diagonally, cast to
# bf16 and padded ONCE (hoisted out of the per-call GEMM wrapper).
# ----------------------------------------------------------------------------
def _block_diag_rows(w_a, w_b, rows_a, rows_b, n_groups):
    """Merge two matrices whose rows come in n_groups interleaved groups into
    one block-diagonal matrix: group g of the result stacks [w_a group g | 0]
    on top of [0 | w_b group g]."""
    na, nb = w_a.shape[1], w_b.shape[1]
    dt = w_a.dtype
    groups = []
    for g in range(n_groups):
        a = w_a[g * rows_a:(g + 1) * rows_a]
        b = w_b[g * rows_b:(g + 1) * rows_b]
        top = jnp.concatenate([a, jnp.zeros((rows_a, nb), dt)], axis=1)
        bot = jnp.concatenate([jnp.zeros((rows_b, na), dt), b], axis=1)
        groups.append(jnp.concatenate([top, bot], axis=0))
    return jnp.concatenate(groups, axis=0)


def init_params(key, input_dim, hidden_dim, output_dim):
    assert input_dim % 8 == 0
    spatial = (input_dim // 8) ** 2          # positions after 3 pools
    ks = iter(jax.random.split(key, 32))

    def nrm(shape, scale=0.05, dtype=jnp.bfloat16):
        return (scale * jax.random.normal(next(ks), shape,
                                          dtype=jnp.float32)).astype(dtype)

    def prep(w, b):
        K, N = w.shape
        Kp, _ = _pad_and_tile_k(K)
        Np, _ = _pad_and_tile_n(N)
        return {
            "w": jnp.pad(w.astype(jnp.bfloat16), ((0, Kp - K), (0, Np - N))),
            "b": jnp.pad(b.astype(jnp.float32), (0, Np - N)).reshape(1, Np),
        }

    # Per-branch weights.  Conv weights are stored as [9*Cin, Cout] in
    # (dh,dw)-major, Cin-minor order (== im2col layout / PyTorch HWIO
    # reshape).  fc1 rows are in NHWC (h,w,c) order -- a re-parameterization
    # of nn.Flatten+Linear; to import PyTorch weights permute fc1 rows from
    # (c,h,w)- to (h,w,c)-major once.
    def branch(out_features):
        return {
            "w2": nrm((9 * 32, 64)), "b2": nrm((64,), dtype=jnp.float32),
            "w3": nrm((9 * 64, 128)), "b3": nrm((128,), dtype=jnp.float32),
            "fc1_w": nrm((spatial * 128, hidden_dim)),
            "fc1_b": nrm((hidden_dim,), dtype=jnp.float32),
            "fc2_w": nrm((hidden_dim, out_features)),
            "fc2_b": nrm((out_features,), dtype=jnp.float32),
        }

    pol, val = branch(output_dim), branch(1)

    # Merged conv1: columns 0..31 = policy branch, 32..63 = value branch.
    conv1_w = jnp.concatenate([nrm((9 * 3, 32)), nrm((9 * 3, 32))], axis=1)
    conv1_b = jnp.concatenate([nrm((32,), dtype=jnp.float32),
                               nrm((32,), dtype=jnp.float32)])

    return {
        "conv1": prep(conv1_w, conv1_b),
        "conv2": prep(_block_diag_rows(pol["w2"], val["w2"], 32, 32, 9),
                      jnp.concatenate([pol["b2"], val["b2"]])),
        "conv3": prep(_block_diag_rows(pol["w3"], val["w3"], 64, 64, 9),
                      jnp.concatenate([pol["b3"], val["b3"]])),
        "fc1": prep(_block_diag_rows(pol["fc1_w"], val["fc1_w"],
                                     128, 128, spatial),
                    jnp.concatenate([pol["fc1_b"], val["fc1_b"]])),
        "fc2": prep(_block_diag_rows(pol["fc2_w"], val["fc2_w"],
                                     hidden_dim, hidden_dim, 1),
                    jnp.concatenate([pol["fc2_b"], val["fc2_b"]])),
    }


if __name__ == "__main__":
    # Small shapes consistent with the module: spatial input_dim must be a
    # multiple of 8; CarRacing discrete action space -> output_dim = 5.
    batch, input_dim, hidden_dim, output_dim = 2, 16, 32, 5

    key = jax.random.PRNGKey(0)
    k_x, k_p = jax.random.split(key)
    x = jax.random.normal(k_x, (batch, 3, input_dim, input_dim),
                          dtype=jnp.float32)
    params = init_params(k_p, input_dim, hidden_dim, output_dim)

    fwd = jax.jit(functools.partial(ppo_forward,
                                    hidden_dim=hidden_dim,
                                    output_dim=output_dim))
    logits, value = jax.block_until_ready(fwd(x, params))

    assert logits.shape == (batch, output_dim)
    assert value.shape == (batch, 1)
    assert bool(jnp.all(jnp.isfinite(logits))) and bool(jnp.all(jnp.isfinite(value)))

    print("KERNEL_OK")
</pallas_src>

<mosaic_0001>
module attributes {stable_mosaic.version = 11 : i64} {
  func.func @_gemm_pool_kernel(%arg0: i32, %arg1: i32, %arg2: i32, %arg3: i32, %arg4: memref<128x32xbf16, #tpu.memory_space<vmem>>, %arg5: memref<32x128xbf16, #tpu.memory_space<vmem>>, %arg6: memref<1x128xf32, #tpu.memory_space<vmem>>, %arg7: memref<128x128xbf16, #tpu.memory_space<vmem>>, %arg8: memref<128x128xf32, #tpu.memory_space<vmem>>, %arg9: memref<128x128xf32, #tpu.memory_space<vmem>>) attributes {dimension_semantics = [#tpu.dimension_semantics<parallel>, #tpu.dimension_semantics<parallel>, #tpu.dimension_semantics<arbitrary>, #tpu.dimension_semantics<arbitrary>], iteration_bounds = array<i64: 1, 1, 4, 1>, scalar_prefetch = 0 : i64, scratch_operands = 2 : i64, tpu.core_type = #tpu.core_type<tc>, window_params = [{transform_indices = @transform_0, window_bounds = array<i64: 128, 32>}, {transform_indices = @transform_1, window_bounds = array<i64: 32, 128>}, {transform_indices = @transform_2, window_bounds = array<i64: 1, 128>}, {transform_indices = @transform_3, window_bounds = array<i64: 128, 128>}]} {
    %c0_i32 = arith.constant 0 : i32
    %0 = arith.cmpi eq, %arg3, %c0_i32 : i32
    %1 = arith.extui %0 : i1 to i32
    %c0_i32_0 = arith.constant 0 : i32
    %2 = arith.cmpi ne, %1, %c0_i32_0 : i32
    scf.if %2 {
      %cst_10 = arith.constant 0.000000e+00 : f32
      %12 = vector.broadcast %cst_10 : f32 to vector<128x128xf32>
      %c0_11 = arith.constant 0 : index
      %c0_12 = arith.constant 0 : index
      %13 = vector.load %arg8[%c0_11, %c0_12] : memref<128x128xf32, #tpu.memory_space<vmem>>, vector<128x128xf32>
      tpu.vector_store %arg8[%c0_11, %c0_12], %12 {strides = array<i32>} : memref<128x128xf32, #tpu.memory_space<vmem>>, vector<128x128xf32>,
    } else {
    }
    %c0 = arith.constant 0 : index
    %c0_1 = arith.constant 0 : index
    %3 = vector.load %arg8[%c0, %c0_1] : memref<128x128xf32, #tpu.memory_space<vmem>>, vector<128x128xf32>
    %c0_2 = arith.constant 0 : index
    %c0_3 = arith.constant 0 : index
    %4 = vector.load %arg4[%c0_2, %c0_3] : memref<128x32xbf16, #tpu.memory_space<vmem>>, vector<128x32xbf16>
    %c0_4 = arith.constant 0 : index
    %c0_5 = arith.constant 0 : index
    %5 = vector.load %arg5[%c0_4, %c0_5] : memref<32x128xbf16, #tpu.memory_space<vmem>>, vector<32x128xbf16>
    %cst = arith.constant dense<0.000000e+00> : vector<128x128xf32>
    %6 = tpu.matmul %4, %5, %cst {dimension_numbers = #tpu.dot_dimension_numbers<[1], [0], [0], [1], [0, 0, 1, 1], [], []>} : vector<128x32xbf16>, vector<32x128xbf16>, vector<128x128xf32> -> vector<128x128xf32>
    %7 = arith.addf %3, %6 : vector<128x128xf32>
    %c0_6 = arith.constant 0 : index
    %c0_7 = arith.constant 0 : index
    %8 = vector.load %arg8[%c0_6, %c0_7] : memref<128x128xf32, #tpu.memory_space<vmem>>, vector<128x128xf32>
    tpu.vector_store %arg8[%c0_6, %c0_7], %7 {strides = array<i32>} : memref<128x128xf32, #tpu.memory_space<vmem>>, vector<128x128xf32>,
    %c0_i32_8 = arith.constant 0 : i32
    %9 = arith.cmpi eq, %arg3, %c0_i32_8 : i32
    %10 = arith.extui %9 : i1 to i32
    %c0_i32_9 = arith.constant 0 : i32
    %11 = arith.cmpi ne, %10, %c0_i32_9 : i32
    scf.if %11 {
      %c0_10 = arith.constant 0 : index
      %c0_11 = arith.constant 0 : index
      %12 = vector.load %arg8[%c0_10, %c0_11] : memref<128x128xf32, #tpu.memory_space<vmem>>, vector<128x128xf32>
      %c0_12 = arith.constant 0 : index
      %c0_13 = arith.constant 0 : index
      %13 = vector.load %arg6[%c0_12, %c0_13] : memref<1x128xf32, #tpu.memory_space<vmem>>, vector<1x128xf32>
      %14 = vector.broadcast %13 : vector<1x128xf32> to vector<128x128xf32>
      %15 = arith.addf %12, %14 : vector<128x128xf32>
      %cst_14 = arith.constant 0.000000e+00 : f32
      %16 = vector.broadcast %cst_14 : f32 to vector<128x128xf32>
      %17 = arith.maximumf %15, %16 : vector<128x128xf32>
      %c0_i32_15 = arith.constant 0 : i32
      %18 = arith.cmpi eq, %arg2, %c0_i32_15 : i32
      %19 = arith.extui %18 : i1 to i32
      %c0_i32_16 = arith.constant 0 : i32
      %20 = arith.cmpi ne, %19, %c0_i32_16 : i32
      scf.if %20 {
        %c0_20 = arith.constant 0 : index
        %c0_21 = arith.constant 0 : index
        %27 = vector.load %arg9[%c0_20, %c0_21] : memref<128x128xf32, #tpu.memory_space<vmem>>, vector<128x128xf32>
        tpu.vector_store %arg9[%c0_20, %c0_21], %17 {strides = array<i32>} : memref<128x128xf32, #tpu.memory_space<vmem>>, vector<128x128xf32>,
      } else {
      }
      %c0_i32_17 = arith.constant 0 : i32
      %21 = arith.cmpi sgt, %arg2, %c0_i32_17 : i32
      %22 = arith.extui %21 : i1 to i32
      %c0_i32_18 = arith.constant 0 : i32
      %23 = arith.cmpi ne, %22, %c0_i32_18 : i32
      scf.if %23 {
        %c0_20 = arith.constant 0 : index
        %c0_21 = arith.constant 0 : index
        %27 = vector.load %arg9[%c0_20, %c0_21] : memref<128x128xf32, #tpu.memory_space<vmem>>, vector<128x128xf32>
        %28 = arith.maximumf %27, %17 : vector<128x128xf32>
        %c0_22 = arith.constant 0 : index
        %c0_23 = arith.constant 0 : index
        %29 = vector.load %arg9[%c0_22, %c0_23] : memref<128x128xf32, #tpu.memory_space<vmem>>, vector<128x128xf32>
        tpu.vector_store %arg9[%c0_22, %c0_23], %28 {strides = array<i32>} : memref<128x128xf32, #tpu.memory_space<vmem>>, vector<128x128xf32>,
      } else {
      }
      %c3_i32 = arith.constant 3 : i32
      %24 = arith.cmpi eq, %arg2, %c3_i32 : i32
      %25 = arith.extui %24 : i1 to i32
      %c0_i32_19 = arith.constant 0 : i32
      %26 = arith.cmpi ne, %25, %c0_i32_19 : i32
      scf.if %26 {
        %c0_20 = arith.constant 0 : index
        %c0_21 = arith.constant 0 : index
        %27 = vector.load %arg9[%c0_20, %c0_21] : memref<128x128xf32, #tpu.memory_space<vmem>>, vector<128x128xf32>
        %28 = arith.truncf %27 : vector<128x128xf32> to vector<128x128xbf16>
        %c0_22 = arith.constant 0 : index
        %c0_23 = arith.constant 0 : index
        %29 = vector.load %arg7[%c0_22, %c0_23] : memref<128x128xbf16, #tpu.memory_space<vmem>>, vector<128x128xbf16>
        tpu.vector_store %arg7[%c0_22, %c0_23], %28 {strides = array<i32>} : memref<128x128xbf16, #tpu.memory_space<vmem>>, vector<128x128xbf16>,
      } else {
      }
    } else {
    }
    return
  }
  func.func @transform_0(%arg0: i32, %arg1: i32, %arg2: i32, %arg3: i32) -> (i32, i32) {
    %c1_i32 = arith.constant 1 : i32
    %0 = arith.muli %arg2, %c1_i32 : i32
    %1 = arith.addi %0, %arg0 : i32
    %c0_i32 = arith.constant 0 : i32
    return %1, %arg3 : i32, i32
  }
  func.func @transform_1(%arg0: i32, %arg1: i32, %arg2: i32, %arg3: i32) -> (i32, i32) {
    %c0_i32 = arith.constant 0 : i32
    return %arg3, %arg1 : i32, i32
  }
  func.func @transform_2(%arg0: i32, %arg1: i32, %arg2: i32, %arg3: i32) -> (i32, i32) {
    %c0_i32 = arith.constant 0 : i32
    %c0_i32_0 = arith.constant 0 : i32
    return %c0_i32, %arg1 : i32, i32
  }
  func.func @transform_3(%arg0: i32, %arg1: i32, %arg2: i32, %arg3: i32) -> (i32, i32) {
    %c0_i32 = arith.constant 0 : i32
    return %arg0, %arg1 : i32, i32
  }
}

module attributes {stable_mosaic.version = 11 : i64} {
  func.func @_gemm_pool_kernel(%arg0: i32, %arg1: i32, %arg2: i32, %arg3: i32, %arg4: memref<32x576xbf16, #tpu.memory_space<vmem>>, %arg5: memref<576x128xbf16, #tpu.memory_space<vmem>>, %arg6: memref<1x128xf32, #tpu.memory_space<vmem>>, %arg7: memref<32x128xbf16, #tpu.memory_space<vmem>>, %arg8: memref<32x128xf32, #tpu.memory_space<vmem>>, %arg9: memref<32x128xf32, #tpu.memory_space<vmem>>) attributes {dimension_semantics = [#tpu.dimension_semantics<parallel>, #tpu.dimension_semantics<parallel>, #tpu.dimension_semantics<arbitrary>, #tpu.dimension_semantics<arbitrary>], iteration_bounds = array<i64: 1, 1, 4, 1>, scalar_prefetch = 0 : i64, scratch_operands = 2 : i64, tpu.core_type = #tpu.core_type<tc>, window_params = [{transform_indices = @transform_0, window_bounds = array<i64: 32, 576>}, {transform_indices = @transform_1, window_bounds = array<i64: 576, 128>}, {transform_indices = @transform_2, window_bounds = array<i64: 1, 128>}, {transform_indices = @transform_3, window_bounds = array<i64: 32, 128>}]} {
    %c0_i32 = arith.constant 0 : i32
    %0 = arith.cmpi eq, %arg3, %c0_i32 : i32
    %1 = arith.extui %0 : i1 to i32
    %c0_i32_0 = arith.constant 0 : i32
    %2 = arith.cmpi ne, %1, %c0_i32_0 : i32
    scf.if %2 {
      %cst_10 = arith.constant 0.000000e+00 : f32
      %12 = vector.broadcast %cst_10 : f32 to vector<32x128xf32>
      %c0_11 = arith.constant 0 : index
      %c0_12 = arith.constant 0 : index
      %13 = vector.load %arg8[%c0_11, %c0_12] : memref<32x128xf32, #tpu.memory_space<vmem>>, vector<32x128xf32>
      tpu.vector_store %arg8[%c0_11, %c0_12], %12 {strides = array<i32>} : memref<32x128xf32, #tpu.memory_space<vmem>>, vector<32x128xf32>,
    } else {
    }
    %c0 = arith.constant 0 : index
    %c0_1 = arith.constant 0 : index
    %3 = vector.load %arg8[%c0, %c0_1] : memref<32x128xf32, #tpu.memory_space<vmem>>, vector<32x128xf32>
    %c0_2 = arith.constant 0 : index
    %c0_3 = arith.constant 0 : index
    %4 = vector.load %arg4[%c0_2, %c0_3] : memref<32x576xbf16, #tpu.memory_space<vmem>>, vector<32x576xbf16>
    %c0_4 = arith.constant 0 : index
    %c0_5 = arith.constant 0 : index
    %5 = vector.load %arg5[%c0_4, %c0_5] : memref<576x128xbf16, #tpu.memory_space<vmem>>, vector<576x128xbf16>
    %cst = arith.constant dense<0.000000e+00> : vector<32x128xf32>
    %6 = tpu.matmul %4, %5, %cst {dimension_numbers = #tpu.dot_dimension_numbers<[1], [0], [0], [1], [0, 0, 1, 1], [], []>} : vector<32x576xbf16>, vector<576x128xbf16>, vector<32x128xf32> -> vector<32x128xf32>
    %7 = arith.addf %3, %6 : vector<32x128xf32>
    %c0_6 = arith.constant 0 : index
    %c0_7 = arith.constant 0 : index
    %8 = vector.load %arg8[%c0_6, %c0_7] : memref<32x128xf32, #tpu.memory_space<vmem>>, vector<32x128xf32>
    tpu.vector_store %arg8[%c0_6, %c0_7], %7 {strides = array<i32>} : memref<32x128xf32, #tpu.memory_space<vmem>>, vector<32x128xf32>,
    %c0_i32_8 = arith.constant 0 : i32
    %9 = arith.cmpi eq, %arg3, %c0_i32_8 : i32
    %10 = arith.extui %9 : i1 to i32
    %c0_i32_9 = arith.constant 0 : i32
    %11 = arith.cmpi ne, %10, %c0_i32_9 : i32
    scf.if %11 {
      %c0_10 = arith.constant 0 : index
      %c0_11 = arith.constant 0 : index
      %12 = vector.load %arg8[%c0_10, %c0_11] : memref<32x128xf32, #tpu.memory_space<vmem>>, vector<32x128xf32>
      %c0_12 = arith.constant 0 : index
      %c0_13 = arith.constant 0 : index
      %13 = vector.load %arg6[%c0_12, %c0_13] : memref<1x128xf32, #tpu.memory_space<vmem>>, vector<1x128xf32>
      %14 = vector.broadcast %13 : vector<1x128xf32> to vector<32x128xf32>
      %15 = arith.addf %12, %14 : vector<32x128xf32>
      %cst_14 = arith.constant 0.000000e+00 : f32
      %16 = vector.broadcast %cst_14 : f32 to vector<32x128xf32>
      %17 = arith.maximumf %15, %16 : vector<32x128xf32>
      %c0_i32_15 = arith.constant 0 : i32
      %18 = arith.cmpi eq, %arg2, %c0_i32_15 : i32
      %19 = arith.extui %18 : i1 to i32
      %c0_i32_16 = arith.constant 0 : i32
      %20 = arith.cmpi ne, %19, %c0_i32_16 : i32
      scf.if %20 {
        %c0_20 = arith.constant 0 : index
        %c0_21 = arith.constant 0 : index
        %27 = vector.load %arg9[%c0_20, %c0_21] : memref<32x128xf32, #tpu.memory_space<vmem>>, vector<32x128xf32>
        tpu.vector_store %arg9[%c0_20, %c0_21], %17 {strides = array<i32>} : memref<32x128xf32, #tpu.memory_space<vmem>>, vector<32x128xf32>,
      } else {
      }
      %c0_i32_17 = arith.constant 0 : i32
      %21 = arith.cmpi sgt, %arg2, %c0_i32_17 : i32
      %22 = arith.extui %21 : i1 to i32
      %c0_i32_18 = arith.constant 0 : i32
      %23 = arith.cmpi ne, %22, %c0_i32_18 : i32
      scf.if %23 {
        %c0_20 = arith.constant 0 : index
        %c0_21 = arith.constant 0 : index
        %27 = vector.load %arg9[%c0_20, %c0_21] : memref<32x128xf32, #tpu.memory_space<vmem>>, vector<32x128xf32>
        %28 = arith.maximumf %27, %17 : vector<32x128xf32>
        %c0_22 = arith.constant 0 : index
        %c0_23 = arith.constant 0 : index
        %29 = vector.load %arg9[%c0_22, %c0_23] : memref<32x128xf32, #tpu.memory_space<vmem>>, vector<32x128xf32>
        tpu.vector_store %arg9[%c0_22, %c0_23], %28 {strides = array<i32>} : memref<32x128xf32, #tpu.memory_space<vmem>>, vector<32x128xf32>,
      } else {
      }
      %c3_i32 = arith.constant 3 : i32
      %24 = arith.cmpi eq, %arg2, %c3_i32 : i32
      %25 = arith.extui %24 : i1 to i32
      %c0_i32_19 = arith.constant 0 : i32
      %26 = arith.cmpi ne, %25, %c0_i32_19 : i32
      scf.if %26 {
        %c0_20 = arith.constant 0 : index
        %c0_21 = arith.constant 0 : index
        %27 = vector.load %arg9[%c0_20, %c0_21] : memref<32x128xf32, #tpu.memory_space<vmem>>, vector<32x128xf32>
        %28 = arith.truncf %27 : vector<32x128xf32> to vector<32x128xbf16>
        %c0_22 = arith.constant 0 : index
        %c0_23 = arith.constant 0 : index
        %29 = vector.load %arg7[%c0_22, %c0_23] : memref<32x128xbf16, #tpu.memory_space<vmem>>, vector<32x128xbf16>
        tpu.vector_store %arg7[%c0_22, %c0_23], %28 {strides = array<i32>} : memref<32x128xbf16, #tpu.memory_space<vmem>>, vector<32x128xbf16>,
      } else {
      }
    } else {
    }
    return
  }
  func.func @transform_0(%arg0: i32, %arg1: i32, %arg2: i32, %arg3: i32) -> (i32, i32) {
    %c1_i32 = arith.constant 1 : i32
    %0 = arith.muli %arg2, %c1_i32 : i32
    %1 = arith.addi %0, %arg0 : i32
    %c0_i32 = arith.constant 0 : i32
    return %1, %arg3 : i32, i32
  }
  func.func @transform_1(%arg0: i32, %arg1: i32, %arg2: i32, %arg3: i32) -> (i32, i32) {
    %c0_i32 = arith.constant 0 : i32
    return %arg3, %arg1 : i32, i32
  }
  func.func @transform_2(%arg0: i32, %arg1: i32, %arg2: i32, %arg3: i32) -> (i32, i32) {
    %c0_i32 = arith.constant 0 : i32
    %c0_i32_0 = arith.constant 0 : i32
    return %c0_i32, %arg1 : i32, i32
  }
  func.func @transform_3(%arg0: i32, %arg1: i32, %arg2: i32, %arg3: i32) -> (i32, i32) {
    %c0_i32 = arith.constant 0 : i32
    return %arg0, %arg1 : i32, i32
  }
}

module attributes {stable_mosaic.version = 11 : i64} {
  func.func @_gemm_pool_kernel(%arg0: i32, %arg1: i32, %arg2: i32, %arg3: i32, %arg4: memref<16x1152xbf16, #tpu.memory_space<vmem>>, %arg5: memref<1152x256xbf16, #tpu.memory_space<vmem>>, %arg6: memref<1x256xf32, #tpu.memory_space<vmem>>, %arg7: memref<16x256xbf16, #tpu.memory_space<vmem>>, %arg8: memref<16x256xf32, #tpu.memory_space<vmem>>, %arg9: memref<16x256xf32, #tpu.memory_space<vmem>>) attributes {dimension_semantics = [#tpu.dimension_semantics<parallel>, #tpu.dimension_semantics<parallel>, #tpu.dimension_semantics<arbitrary>, #tpu.dimension_semantics<arbitrary>], iteration_bounds = array<i64: 1, 1, 4, 1>, scalar_prefetch = 0 : i64, scratch_operands = 2 : i64, tpu.core_type = #tpu.core_type<tc>, window_params = [{transform_indices = @transform_0, window_bounds = array<i64: 16, 1152>}, {transform_indices = @transform_1, window_bounds = array<i64: 1152, 256>}, {transform_indices = @transform_2, window_bounds = array<i64: 1, 256>}, {transform_indices = @transform_3, window_bounds = array<i64: 16, 256>}]} {
    %c0_i32 = arith.constant 0 : i32
    %0 = arith.cmpi eq, %arg3, %c0_i32 : i32
    %1 = arith.extui %0 : i1 to i32
    %c0_i32_0 = arith.constant 0 : i32
    %2 = arith.cmpi ne, %1, %c0_i32_0 : i32
    scf.if %2 {
      %cst_10 = arith.constant 0.000000e+00 : f32
      %12 = vector.broadcast %cst_10 : f32 to vector<16x256xf32>
      %c0_11 = arith.constant 0 : index
      %c0_12 = arith.constant 0 : index
      %13 = vector.load %arg8[%c0_11, %c0_12] : memref<16x256xf32, #tpu.memory_space<vmem>>, vector<16x256xf32>
      tpu.vector_store %arg8[%c0_11, %c0_12], %12 {strides = array<i32>} : memref<16x256xf32, #tpu.memory_space<vmem>>, vector<16x256xf32>,
    } else {
    }
    %c0 = arith.constant 0 : index
    %c0_1 = arith.constant 0 : index
    %3 = vector.load %arg8[%c0, %c0_1] : memref<16x256xf32, #tpu.memory_space<vmem>>, vector<16x256xf32>
    %c0_2 = arith.constant 0 : index
    %c0_3 = arith.constant 0 : index
    %4 = vector.load %arg4[%c0_2, %c0_3] : memref<16x1152xbf16, #tpu.memory_space<vmem>>, vector<16x1152xbf16>
    %c0_4 = arith.constant 0 : index
    %c0_5 = arith.constant 0 : index
    %5 = vector.load %arg5[%c0_4, %c0_5] : memref<1152x256xbf16, #tpu.memory_space<vmem>>, vector<1152x256xbf16>
    %cst = arith.constant dense<0.000000e+00> : vector<16x256xf32>
    %6 = tpu.matmul %4, %5, %cst {dimension_numbers = #tpu.dot_dimension_numbers<[1], [0], [0], [1], [0, 0, 1, 1], [], []>} : vector<16x1152xbf16>, vector<1152x256xbf16>, vector<16x256xf32> -> vector<16x256xf32>
    %7 = arith.addf %3, %6 : vector<16x256xf32>
    %c0_6 = arith.constant 0 : index
    %c0_7 = arith.constant 0 : index
    %8 = vector.load %arg8[%c0_6, %c0_7] : memref<16x256xf32, #tpu.memory_space<vmem>>, vector<16x256xf32>
    tpu.vector_store %arg8[%c0_6, %c0_7], %7 {strides = array<i32>} : memref<16x256xf32, #tpu.memory_space<vmem>>, vector<16x256xf32>,
    %c0_i32_8 = arith.constant 0 : i32
    %9 = arith.cmpi eq, %arg3, %c0_i32_8 : i32
    %10 = arith.extui %9 : i1 to i32
    %c0_i32_9 = arith.constant 0 : i32
    %11 = arith.cmpi ne, %10, %c0_i32_9 : i32
    scf.if %11 {
      %c0_10 = arith.constant 0 : index
      %c0_11 = arith.constant 0 : index
      %12 = vector.load %arg8[%c0_10, %c0_11] : memref<16x256xf32, #tpu.memory_space<vmem>>, vector<16x256xf32>
      %c0_12 = arith.constant 0 : index
      %c0_13 = arith.constant 0 : index
      %13 = vector.load %arg6[%c0_12, %c0_13] : memref<1x256xf32, #tpu.memory_space<vmem>>, vector<1x256xf32>
      %14 = vector.broadcast %13 : vector<1x256xf32> to vector<16x256xf32>
      %15 = arith.addf %12, %14 : vector<16x256xf32>
      %cst_14 = arith.constant 0.000000e+00 : f32
      %16 = vector.broadcast %cst_14 : f32 to vector<16x256xf32>
      %17 = arith.maximumf %15, %16 : vector<16x256xf32>
      %c0_i32_15 = arith.constant 0 : i32
      %18 = arith.cmpi eq, %arg2, %c0_i32_15 : i32
      %19 = arith.extui %18 : i1 to i32
      %c0_i32_16 = arith.constant 0 : i32
      %20 = arith.cmpi ne, %19, %c0_i32_16 : i32
      scf.if %20 {
        %c0_20 = arith.constant 0 : index
        %c0_21 = arith.constant 0 : index
        %27 = vector.load %arg9[%c0_20, %c0_21] : memref<16x256xf32, #tpu.memory_space<vmem>>, vector<16x256xf32>
        tpu.vector_store %arg9[%c0_20, %c0_21], %17 {strides = array<i32>} : memref<16x256xf32, #tpu.memory_space<vmem>>, vector<16x256xf32>,
      } else {
      }
      %c0_i32_17 = arith.constant 0 : i32
      %21 = arith.cmpi sgt, %arg2, %c0_i32_17 : i32
      %22 = arith.extui %21 : i1 to i32
      %c0_i32_18 = arith.constant 0 : i32
      %23 = arith.cmpi ne, %22, %c0_i32_18 : i32
      scf.if %23 {
        %c0_20 = arith.constant 0 : index
        %c0_21 = arith.constant 0 : index
        %27 = vector.load %arg9[%c0_20, %c0_21] : memref<16x256xf32, #tpu.memory_space<vmem>>, vector<16x256xf32>
        %28 = arith.maximumf %27, %17 : vector<16x256xf32>
        %c0_22 = arith.constant 0 : index
        %c0_23 = arith.constant 0 : index
        %29 = vector.load %arg9[%c0_22, %c0_23] : memref<16x256xf32, #tpu.memory_space<vmem>>, vector<16x256xf32>
        tpu.vector_store %arg9[%c0_22, %c0_23], %28 {strides = array<i32>} : memref<16x256xf32, #tpu.memory_space<vmem>>, vector<16x256xf32>,
      } else {
      }
      %c3_i32 = arith.constant 3 : i32
      %24 = arith.cmpi eq, %arg2, %c3_i32 : i32
      %25 = arith.extui %24 : i1 to i32
      %c0_i32_19 = arith.constant 0 : i32
      %26 = arith.cmpi ne, %25, %c0_i32_19 : i32
      scf.if %26 {
        %c0_20 = arith.constant 0 : index
        %c0_21 = arith.constant 0 : index
        %27 = vector.load %arg9[%c0_20, %c0_21] : memref<16x256xf32, #tpu.memory_space<vmem>>, vector<16x256xf32>
        %28 = arith.truncf %27 : vector<16x256xf32> to vector<16x256xbf16>
        %c0_22 = arith.constant 0 : index
        %c0_23 = arith.constant 0 : index
        %29 = vector.load %arg7[%c0_22, %c0_23] : memref<16x256xbf16, #tpu.memory_space<vmem>>, vector<16x256xbf16>
        tpu.vector_store %arg7[%c0_22, %c0_23], %28 {strides = array<i32>} : memref<16x256xbf16, #tpu.memory_space<vmem>>, vector<16x256xbf16>,
      } else {
      }
    } else {
    }
    return
  }
  func.func @transform_0(%arg0: i32, %arg1: i32, %arg2: i32, %arg3: i32) -> (i32, i32) {
    %c1_i32 = arith.constant 1 : i32
    %0 = arith.muli %arg2, %c1_i32 : i32
    %1 = arith.addi %0, %arg0 : i32
    %c0_i32 = arith.constant 0 : i32
    return %1, %arg3 : i32, i32
  }
  func.func @transform_1(%arg0: i32, %arg1: i32, %arg2: i32, %arg3: i32) -> (i32, i32) {
    %c0_i32 = arith.constant 0 : i32
    return %arg3, %arg1 : i32, i32
  }
  func.func @transform_2(%arg0: i32, %arg1: i32, %arg2: i32, %arg3: i32) -> (i32, i32) {
    %c0_i32 = arith.constant 0 : i32
    %c0_i32_0 = arith.constant 0 : i32
    return %c0_i32, %arg1 : i32, i32
  }
  func.func @transform_3(%arg0: i32, %arg1: i32, %arg2: i32, %arg3: i32) -> (i32, i32) {
    %c0_i32 = arith.constant 0 : i32
    return %arg0, %arg1 : i32, i32
  }
}

module attributes {stable_mosaic.version = 11 : i64} {
  func.func @_gemm_pool_kernel(%arg0: i32, %arg1: i32, %arg2: i32, %arg3: i32, %arg4: memref<16x64xbf16, #tpu.memory_space<vmem>>, %arg5: memref<64x128xbf16, #tpu.memory_space<vmem>>, %arg6: memref<1x128xf32, #tpu.memory_space<vmem>>, %arg7: memref<16x128xf32, #tpu.memory_space<vmem>>, %arg8: memref<16x128xf32, #tpu.memory_space<vmem>>, %arg9: memref<16x128xf32, #tpu.memory_space<vmem>>) attributes {dimension_semantics = [#tpu.dimension_semantics<parallel>, #tpu.dimension_semantics<parallel>, #tpu.dimension_semantics<arbitrary>, #tpu.dimension_semantics<arbitrary>], iteration_bounds = array<i64: 1, 1, 1, 1>, scalar_prefetch = 0 : i64, scratch_operands = 2 : i64, tpu.core_type = #tpu.core_type<tc>, window_params = [{transform_indices = @transform_0, window_bounds = array<i64: 16, 64>}, {transform_indices = @transform_1, window_bounds = array<i64: 64, 128>}, {transform_indices = @transform_2, window_bounds = array<i64: 1, 128>}, {transform_indices = @transform_3, window_bounds = array<i64: 16, 128>}]} {
    %c0_i32 = arith.constant 0 : i32
    %0 = arith.cmpi eq, %arg3, %c0_i32 : i32
    %1 = arith.extui %0 : i1 to i32
    %c0_i32_0 = arith.constant 0 : i32
    %2 = arith.cmpi ne, %1, %c0_i32_0 : i32
    scf.if %2 {
      %cst_10 = arith.constant 0.000000e+00 : f32
      %12 = vector.broadcast %cst_10 : f32 to vector<16x128xf32>
      %c0_11 = arith.constant 0 : index
      %c0_12 = arith.constant 0 : index
      %13 = vector.load %arg8[%c0_11, %c0_12] : memref<16x128xf32, #tpu.memory_space<vmem>>, vector<16x128xf32>
      tpu.vector_store %arg8[%c0_11, %c0_12], %12 {strides = array<i32>} : memref<16x128xf32, #tpu.memory_space<vmem>>, vector<16x128xf32>,
    } else {
    }
    %c0 = arith.constant 0 : index
    %c0_1 = arith.constant 0 : index
    %3 = vector.load %arg8[%c0, %c0_1] : memref<16x128xf32, #tpu.memory_space<vmem>>, vector<16x128xf32>
    %c0_2 = arith.constant 0 : index
    %c0_3 = arith.constant 0 : index
    %4 = vector.load %arg4[%c0_2, %c0_3] : memref<16x64xbf16, #tpu.memory_space<vmem>>, vector<16x64xbf16>
    %c0_4 = arith.constant 0 : index
    %c0_5 = arith.constant 0 : index
    %5 = vector.load %arg5[%c0_4, %c0_5] : memref<64x128xbf16, #tpu.memory_space<vmem>>, vector<64x128xbf16>
    %cst = arith.constant dense<0.000000e+00> : vector<16x128xf32>
    %6 = tpu.matmul %4, %5, %cst {dimension_numbers = #tpu.dot_dimension_numbers<[1], [0], [0], [1], [0, 0, 1, 1], [], []>} : vector<16x64xbf16>, vector<64x128xbf16>, vector<16x128xf32> -> vector<16x128xf32>
    %7 = arith.addf %3, %6 : vector<16x128xf32>
    %c0_6 = arith.constant 0 : index
    %c0_7 = arith.constant 0 : index
    %8 = vector.load %arg8[%c0_6, %c0_7] : memref<16x128xf32, #tpu.memory_space<vmem>>, vector<16x128xf32>
    tpu.vector_store %arg8[%c0_6, %c0_7], %7 {strides = array<i32>} : memref<16x128xf32, #tpu.memory_space<vmem>>, vector<16x128xf32>,
    %c0_i32_8 = arith.constant 0 : i32
    %9 = arith.cmpi eq, %arg3, %c0_i32_8 : i32
    %10 = arith.extui %9 : i1 to i32
    %c0_i32_9 = arith.constant 0 : i32
    %11 = arith.cmpi ne, %10, %c0_i32_9 : i32
    scf.if %11 {
      %c0_10 = arith.constant 0 : index
      %c0_11 = arith.constant 0 : index
      %12 = vector.load %arg8[%c0_10, %c0_11] : memref<16x128xf32, #tpu.memory_space<vmem>>, vector<16x128xf32>
      %c0_12 = arith.constant 0 : index
      %c0_13 = arith.constant 0 : index
      %13 = vector.load %arg6[%c0_12, %c0_13] : memref<1x128xf32, #tpu.memory_space<vmem>>, vector<1x128xf32>
      %14 = vector.broadcast %13 : vector<1x128xf32> to vector<16x128xf32>
      %15 = arith.addf %12, %14 : vector<16x128xf32>
      %c0_i32_14 = arith.constant 0 : i32
      %16 = arith.cmpi eq, %arg2, %c0_i32_14 : i32
      %17 = arith.extui %16 : i1 to i32
      %c0_i32_15 = arith.constant 0 : i32
      %18 = arith.cmpi ne, %17, %c0_i32_15 : i32
      scf.if %18 {
        %c0_20 = arith.constant 0 : index
        %c0_21 = arith.constant 0 : index
        %25 = vector.load %arg9[%c0_20, %c0_21] : memref<16x128xf32, #tpu.memory_space<vmem>>, vector<16x128xf32>
        tpu.vector_store %arg9[%c0_20, %c0_21], %15 {strides = array<i32>} : memref<16x128xf32, #tpu.memory_space<vmem>>, vector<16x128xf32>,
      } else {
      }
      %c0_i32_16 = arith.constant 0 : i32
      %19 = arith.cmpi sgt, %arg2, %c0_i32_16 : i32
      %20 = arith.extui %19 : i1 to i32
      %c0_i32_17 = arith.constant 0 : i32
      %21 = arith.cmpi ne, %20, %c0_i32_17 : i32
      scf.if %21 {
        %c0_20 = arith.constant 0 : index
        %c0_21 = arith.constant 0 : index
        %25 = vector.load %arg9[%c0_20, %c0_21] : memref<16x128xf32, #tpu.memory_space<vmem>>, vector<16x128xf32>
        %26 = arith.maximumf %25, %15 : vector<16x128xf32>
        %c0_22 = arith.constant 0 : index
        %c0_23 = arith.constant 0 : index
        %27 = vector.load %arg9[%c0_22, %c0_23] : memref<16x128xf32, #tpu.memory_space<vmem>>, vector<16x128xf32>
        tpu.vector_store %arg9[%c0_22, %c0_23], %26 {strides = array<i32>} : memref<16x128xf32, #tpu.memory_space<vmem>>, vector<16x128xf32>,
      } else {
      }
      %c0_i32_18 = arith.constant 0 : i32
      %22 = arith.cmpi eq, %arg2, %c0_i32_18 : i32
      %23 = arith.extui %22 : i1 to i32
      %c0_i32_19 = arith.constant 0 : i32
      %24 = arith.cmpi ne, %23, %c0_i32_19 : i32
      scf.if %24 {
        %c0_20 = arith.constant 0 : index
        %c0_21 = arith.constant 0 : index
        %25 = vector.load %arg9[%c0_20, %c0_21] : memref<16x128xf32, #tpu.memory_space<vmem>>, vector<16x128xf32>
        %c0_22 = arith.constant 0 : index
        %c0_23 = arith.constant 0 : index
        %26 = vector.load %arg7[%c0_22, %c0_23] : memref<16x128xf32, #tpu.memory_space<vmem>>, vector<16x128xf32>
        tpu.vector_store %arg7[%c0_22, %c0_23], %25 {strides = array<i32>} : memref<16x128xf32, #tpu.memory_space<vmem>>, vector<16x128xf32>,
      } else {
      }
    } else {
    }
    return
  }
  func.func @transform_0(%arg0: i32, %arg1: i32, %arg2: i32, %arg3: i32) -> (i32, i32) {
    %c1_i32 = arith.constant 1 : i32
    %0 = arith.muli %arg2, %c1_i32 : i32
    %1 = arith.addi %0, %arg0 : i32
    %c0_i32 = arith.constant 0 : i32
    return %1, %arg3 : i32, i32
  }
  func.func @transform_1(%arg0: i32, %arg1: i32, %arg2: i32, %arg3: i32) -> (i32, i32) {
    %c0_i32 = arith.constant 0 : i32
    return %arg3, %arg1 : i32, i32
  }
  func.func @transform_2(%arg0: i32, %arg1: i32, %arg2: i32, %arg3: i32) -> (i32, i32) {
    %c0_i32 = arith.constant 0 : i32
    %c0_i32_0 = arith.constant 0 : i32
    return %c0_i32, %arg1 : i32, i32
  }
  func.func @transform_3(%arg0: i32, %arg1: i32, %arg2: i32, %arg3: i32) -> (i32, i32) {
    %c0_i32 = arith.constant 0 : i32
    return %arg0, %arg1 : i32, i32
  }
}

module attributes {stable_mosaic.version = 11 : i64} {
  func.func @_gemm_pool_kernel(%arg0: i32, %arg1: i32, %arg2: i32, %arg3: i32, %arg4: memref<16x1024xbf16, #tpu.memory_space<vmem>>, %arg5: memref<1024x128xbf16, #tpu.memory_space<vmem>>, %arg6: memref<1x128xf32, #tpu.memory_space<vmem>>, %arg7: memref<16x128xbf16, #tpu.memory_space<vmem>>, %arg8: memref<16x128xf32, #tpu.memory_space<vmem>>, %arg9: memref<16x128xf32, #tpu.memory_space<vmem>>) attributes {dimension_semantics = [#tpu.dimension_semantics<parallel>, #tpu.dimension_semantics<parallel>, #tpu.dimension_semantics<arbitrary>, #tpu.dimension_semantics<arbitrary>], iteration_bounds = array<i64: 1, 1, 1, 1>, scalar_prefetch = 0 : i64, scratch_operands = 2 : i64, tpu.core_type = #tpu.core_type<tc>, window_params = [{transform_indices = @transform_0, window_bounds = array<i64: 16, 1024>}, {transform_indices = @transform_1, window_bounds = array<i64: 1024, 128>}, {transform_indices = @transform_2, window_bounds = array<i64: 1, 128>}, {transform_indices = @transform_3, window_bounds = array<i64: 16, 128>}]} {
    %c0_i32 = arith.constant 0 : i32
    %0 = arith.cmpi eq, %arg3, %c0_i32 : i32
    %1 = arith.extui %0 : i1 to i32
    %c0_i32_0 = arith.constant 0 : i32
    %2 = arith.cmpi ne, %1, %c0_i32_0 : i32
    scf.if %2 {
      %cst_10 = arith.constant 0.000000e+00 : f32
      %12 = vector.broadcast %cst_10 : f32 to vector<16x128xf32>
      %c0_11 = arith.constant 0 : index
      %c0_12 = arith.constant 0 : index
      %13 = vector.load %arg8[%c0_11, %c0_12] : memref<16x128xf32, #tpu.memory_space<vmem>>, vector<16x128xf32>
      tpu.vector_store %arg8[%c0_11, %c0_12], %12 {strides = array<i32>} : memref<16x128xf32, #tpu.memory_space<vmem>>, vector<16x128xf32>,
    } else {
    }
    %c0 = arith.constant 0 : index
    %c0_1 = arith.constant 0 : index
    %3 = vector.load %arg8[%c0, %c0_1] : memref<16x128xf32, #tpu.memory_space<vmem>>, vector<16x128xf32>
    %c0_2 = arith.constant 0 : index
    %c0_3 = arith.constant 0 : index
    %4 = vector.load %arg4[%c0_2, %c0_3] : memref<16x1024xbf16, #tpu.memory_space<vmem>>, vector<16x1024xbf16>
    %c0_4 = arith.constant 0 : index
    %c0_5 = arith.constant 0 : index
    %5 = vector.load %arg5[%c0_4, %c0_5] : memref<1024x128xbf16, #tpu.memory_space<vmem>>, vector<1024x128xbf16>
    %cst = arith.constant dense<0.000000e+00> : vector<16x128xf32>
    %6 = tpu.matmul %4, %5, %cst {dimension_numbers = #tpu.dot_dimension_numbers<[1], [0], [0], [1], [0, 0, 1, 1], [], []>} : vector<16x1024xbf16>, vector<1024x128xbf16>, vector<16x128xf32> -> vector<16x128xf32>
    %7 = arith.addf %3, %6 : vector<16x128xf32>
    %c0_6 = arith.constant 0 : index
    %c0_7 = arith.constant 0 : index
    %8 = vector.load %arg8[%c0_6, %c0_7] : memref<16x128xf32, #tpu.memory_space<vmem>>, vector<16x128xf32>
    tpu.vector_store %arg8[%c0_6, %c0_7], %7 {strides = array<i32>} : memref<16x128xf32, #tpu.memory_space<vmem>>, vector<16x128xf32>,
    %c0_i32_8 = arith.constant 0 : i32
    %9 = arith.cmpi eq, %arg3, %c0_i32_8 : i32
    %10 = arith.extui %9 : i1 to i32
    %c0_i32_9 = arith.constant 0 : i32
    %11 = arith.cmpi ne, %10, %c0_i32_9 : i32
    scf.if %11 {
      %c0_10 = arith.constant 0 : index
      %c0_11 = arith.constant 0 : index
      %12 = vector.load %arg8[%c0_10, %c0_11] : memref<16x128xf32, #tpu.memory_space<vmem>>, vector<16x128xf32>
      %c0_12 = arith.constant 0 : index
      %c0_13 = arith.constant 0 : index
      %13 = vector.load %arg6[%c0_12, %c0_13] : memref<1x128xf32, #tpu.memory_space<vmem>>, vector<1x128xf32>
      %14 = vector.broadcast %13 : vector<1x128xf32> to vector<16x128xf32>
      %15 = arith.addf %12, %14 : vector<16x128xf32>
      %cst_14 = arith.constant 0.000000e+00 : f32
      %16 = vector.broadcast %cst_14 : f32 to vector<16x128xf32>
      %17 = arith.maximumf %15, %16 : vector<16x128xf32>
      %c0_i32_15 = arith.constant 0 : i32
      %18 = arith.cmpi eq, %arg2, %c0_i32_15 : i32
      %19 = arith.extui %18 : i1 to i32
      %c0_i32_16 = arith.constant 0 : i32
      %20 = arith.cmpi ne, %19, %c0_i32_16 : i32
      scf.if %20 {
        %c0_21 = arith.constant 0 : index
        %c0_22 = arith.constant 0 : index
        %27 = vector.load %arg9[%c0_21, %c0_22] : memref<16x128xf32, #tpu.memory_space<vmem>>, vector<16x128xf32>
        tpu.vector_store %arg9[%c0_21, %c0_22], %17 {strides = array<i32>} : memref<16x128xf32, #tpu.memory_space<vmem>>, vector<16x128xf32>,
      } else {
      }
      %c0_i32_17 = arith.constant 0 : i32
      %21 = arith.cmpi sgt, %arg2, %c0_i32_17 : i32
      %22 = arith.extui %21 : i1 to i32
      %c0_i32_18 = arith.constant 0 : i32
      %23 = arith.cmpi ne, %22, %c0_i32_18 : i32
      scf.if %23 {
        %c0_21 = arith.constant 0 : index
        %c0_22 = arith.constant 0 : index
        %27 = vector.load %arg9[%c0_21, %c0_22] : memref<16x128xf32, #tpu.memory_space<vmem>>, vector<16x128xf32>
        %28 = arith.maximumf %27, %17 : vector<16x128xf32>
        %c0_23 = arith.constant 0 : index
        %c0_24 = arith.constant 0 : index
        %29 = vector.load %arg9[%c0_23, %c0_24] : memref<16x128xf32, #tpu.memory_space<vmem>>, vector<16x128xf32>
        tpu.vector_store %arg9[%c0_23, %c0_24], %28 {strides = array<i32>} : memref<16x128xf32, #tpu.memory_space<vmem>>, vector<16x128xf32>,
      } else {
      }
      %c0_i32_19 = arith.constant 0 : i32
      %24 = arith.cmpi eq, %arg2, %c0_i32_19 : i32
      %25 = arith.extui %24 : i1 to i32
      %c0_i32_20 = arith.constant 0 : i32
      %26 = arith.cmpi ne, %25, %c0_i32_20 : i32
      scf.if %26 {
        %c0_21 = arith.constant 0 : index
        %c0_22 = arith.constant 0 : index
        %27 = vector.load %arg9[%c0_21, %c0_22] : memref<16x128xf32, #tpu.memory_space<vmem>>, vector<16x128xf32>
        %28 = arith.truncf %27 : vector<16x128xf32> to vector<16x128xbf16>
        %c0_23 = arith.constant 0 : index
        %c0_24 = arith.constant 0 : index
        %29 = vector.load %arg7[%c0_23, %c0_24] : memref<16x128xbf16, #tpu.memory_space<vmem>>, vector<16x128xbf16>
        tpu.vector_store %arg7[%c0_23, %c0_24], %28 {strides = array<i32>} : memref<16x128xbf16, #tpu.memory_space<vmem>>, vector<16x128xbf16>,
      } else {
      }
    } else {
    }
    return
  }
  func.func @transform_0(%arg0: i32, %arg1: i32, %arg2: i32, %arg3: i32) -> (i32, i32) {
    %c1_i32 = arith.constant 1 : i32
    %0 = arith.muli %arg2, %c1_i32 : i32
    %1 = arith.addi %0, %arg0 : i32
    %c0_i32 = arith.constant 0 : i32
    return %1, %arg3 : i32, i32
  }
  func.func @transform_1(%arg0: i32, %arg1: i32, %arg2: i32, %arg3: i32) -> (i32, i32) {
    %c0_i32 = arith.constant 0 : i32
    return %arg3, %arg1 : i32, i32
  }
  func.func @transform_2(%arg0: i32, %arg1: i32, %arg2: i32, %arg3: i32) -> (i32, i32) {
    %c0_i32 = arith.constant 0 : i32
    %c0_i32_0 = arith.constant 0 : i32
    return %c0_i32, %arg1 : i32, i32
  }
  func.func @transform_3(%arg0: i32, %arg1: i32, %arg2: i32, %arg3: i32) -> (i32, i32) {
    %c0_i32 = arith.constant 0 : i32
    return %arg0, %arg1 : i32, i32
  }
}

</mosaic_0001>

<bundles_post_ra>
// kernel: ppo_forward.5
= control target key start
LH: loop header
LB: loop body
LE: loop exit
PB: predicated region body
PF: predicated region fallthrough
CT: control target
= control target key end

     0   :  { %s1102_s12 = smov 0   ;;  %s1104_s13 = smov 0   ;;  %s1244_s0 = inlined_call_operand.vmem [shape: bf16[512,32], index: 0, kind: input, shape index: {}]   ;;  %s1245_s1 = inlined_call_operand.vmem [shape: bf16[32,128], index: 1, kind: input, shape index: {}]   ;;  %s1246_s2 = inlined_call_operand.vmem [shape: f32[1,128], index: 2, kind: input, shape index: {}]   ;;  %s1247_s3 = inlined_call_operand.vmem [shape: bf16[128,128], index: 3, kind: output, shape index: {}]  }
   0x1   :  { %s1106_s14 = smov 0  }
   0x2 LB: > { %s31_s15 = sadd.s32 1, %s1076_s13  ;;  %p882_p0 = scmp.ge.s32.totalorder %s1080_s14, 1  ;;  %s1080_s14 = sphi %s1106_s14, %s13_s14   ;;  %s1076_s13 = sphi %s1104_s13, %s1249_s13   ;;  %s1072_s12 = sphi %s1102_s12, %s1248_s12  }
   0x3   : > { %p33_p1 = scmp.ge.s32.totalorder %s31_s15, 4  ;;  %p199_p2 = scmp.lt.s32.totalorder %s1080_s14, 5 }
   0x5   : > { %s1251_s15 = smov (%p33_p1, %s31_s15), 0  ;;  %p200_p3 = pnand %p882_p0, %p199_p2 }
   0x6   : > { %s883_s18 = sshll.u32 (!%p200_p3), %s1072_s12, 4  ;;  %p904_p5 = scmp.ne.s32.totalorder (!%p200_p3), %s1072_s12, 0 }
   0x7   : > { %203 = sbr.rel (%p200_p3) target bundleno = 273 (0x111), region = 32  ;;  %p243_p4 = scmp.lt.s32.totalorder (!%p200_p3), %s883_s18, 63 }
   0xc   : > { %v1048_v0 = vld [vmem:[%s1245_s1 + $0x8] sm:$0xff]   ;;  %v1049_v1 = vld [vmem:[%s1245_s1] sm:$0xff]   ;;  %s1253_s18 = smov (!%p243_p4, %s883_s18), 63  ;;  %vm382_vm0 = vcmask 261120  }
   0xd   : > { %1000 = vmatprep.subr.bf16.mxu0 %v1048_v0  ;;  %1020 = vmatprep.subr.bf16.mxu1 %v1048_v0  ;;  %s884_s21 = sshll.u32 %s1253_s18, 2  ;;  %v903_v10 = vld [vmem:[%s1246_s2] ss:$0 sm:$0xff] }
   0xe   : > { %1001 = vmatpush3.bf16.msra.mxu0 %v1048_v0  ;;  %1022 = vmatpush3.bf16.msra.mxu1 %v1048_v0  ;;  %s249_s24 = scalar_lea.vmem %s1244_s0, %s884_s21 }
   0xf   : > { %1002 = vmatprep.subr.bf16.mxu0 %v1049_v1  ;;  %1021 = vmatprep.subr.bf16.mxu1 %v1049_v1  ;;  %v1050_v2 = vld [vmem:[%s249_s24] sm:$0xff]   ;;  %v1052_v4 = vld [vmem:[%s249_s24 + $0x8] sm:$0xff]   ;;  %v1054_v6 = vld [vmem:[%s249_s24 + $0x10] sm:$0xff]  }
  0x10   : > { %v1051_v3 = vld [vmem:[%s249_s24 + $0x20] sm:$0xff]   ;;  %1004 = vmatprep.mubr.msk.bf16.mxu0 %vm382_vm0, %v1050_v2  ;;  %v1053_v5 = vld [vmem:[%s249_s24 + $0x28] sm:$0xff]   ;;  %v1055_v7 = vld [vmem:[%s249_s24 + $0x30] sm:$0xff]  }
  0x11   : > { %1012 = vmatprep.mubr.msk.bf16.mxu1 %vm382_vm0, %v1051_v3  ;;  %v1056_v8 = vld [vmem:[%s249_s24 + $0x18] sm:$0xff]  }
  0x12   : > { %1003 = vmatpush3.bf16.msra.mxu0 %v1049_v1  ;;  %1023 = vmatpush3.bf16.msra.mxu1 %v1049_v1  ;;  %v1057_v9 = vld [vmem:[%s249_s24 + $0x38] sm:$0xff]  }
  0x15   : > { %1005 = vmatmul.mubr.msk.bf16.vlgmr.msra.gmra.mxu0 %vm382_vm0, %v1052_v4  ;;  %1013 = vmatmul.mubr.msk.bf16.vlgmr.msra.gmra.mxu1 %vm382_vm0, %v1053_v5 }
  0x16   : > { %1008 = vmatprep.mubr.msk.bf16.mxu0 %vm382_vm0, %v1054_v6  ;;  %1016 = vmatprep.mubr.msk.bf16.mxu1 %vm382_vm0, %v1055_v7 }
  0x1d   : > { %1009 = vmatmul.mubr.msk.bf16.gmra.mxu0 %vm382_vm0, %v1056_v8  ;;  %1017 = vmatmul.mubr.msk.bf16.gmra.mxu1 %vm382_vm0, %v1057_v9 }
  0xd5   : > { %v1006_v11 = vpop.f32.mrf.mxu0  ;;  %v1014_v13 = vpop.f32.mrf.mxu1 }
  0xd6   : > { %v1143_v12 = vadd.f32 %v1006_v11, %v903_v10  ;;  %v1145_v14 = vadd.f32 %v1014_v13, %v903_v10 }
  0xd7   : > { %v441_v15 = vpop.f32.mrf.mxu0  ;;  %v473_v18 = vpop.f32.mrf.mxu1 }
  0xd8   : > { %v580_v16 = vmax.f32 %v1143_v12, 0.0  ;;  %v1148_v17 = vadd.f32 %v903_v10, %v441_v15  ;;  %v588_v19 = vmax.f32 %v1145_v14, 0.0  ;;  %v1151_v20 = vadd.f32 %v903_v10, %v473_v18 }
  0xd9   : > { %v1007_v21 = vpop.f32.mrf.mxu0  ;;  %v1015_v24 = vpop.f32.mrf.mxu1 }
  0xda   : > { %v578_v22 = vmax.f32 %v1148_v17, 0.0  ;;  %v1154_v23 = vadd.f32 %v1007_v21, %v903_v10  ;;  %v586_v25 = vmax.f32 %v1151_v20, 0.0  ;;  %v1157_v26 = vadd.f32 %v1015_v24, %v903_v10 }
  0xdb   : > { %v444_v27 = vpop.f32.mrf.mxu0  ;;  %v476_v30 = vpop.f32.mrf.mxu1 }
  0xdc   : > { %v581_v28 = vmax.f32 %v1154_v23, 0.0  ;;  %v563_v29 = vadd.f32 %v903_v10, %v444_v27  ;;  %v589_v31 = vmax.f32 %v1157_v26, 0.0  ;;  %v1161_v32 = vadd.f32 %v903_v10, %v476_v30 }
  0xdd   : > { %v1010_v33 = vpop.f32.mrf.mxu0  ;;  %v1018_v36 = vpop.f32.mrf.mxu1 }
  0xde   : > { %v579_v34 = vmax.f32 %v563_v29, 0.0  ;;  %v1163_v35 = vadd.f32 %v1010_v33, %v903_v10  ;;  %v587_v37 = vmax.f32 %v1161_v32, 0.0  ;;  %v1166_v38 = vadd.f32 %v1018_v36, %v903_v10 }
  0xdf   : > { %v457_v39 = vpop.f32.mrf.mxu0  ;;  %v489_v42 = vpop.f32.mrf.mxu1 }
  0xe0   : > { %v584_v40 = vmax.f32 %v1163_v35, 0.0  ;;  %v566_v41 = vadd.f32 %v903_v10, %v457_v39  ;;  %v592_v43 = vmax.f32 %v1166_v38, 0.0  ;;  %v1170_v44 = vadd.f32 %v903_v10, %v489_v42 }
  0xe1   : > { %v1011_v45 = vpop.f32.mrf.mxu0  ;;  %v1019_v48 = vpop.f32.mrf.mxu1 }
  0xe2   : > { %v582_v46 = vmax.f32 %v566_v41, 0.0  ;;  %v569_v47 = vadd.f32 %v1011_v45, %v903_v10  ;;  %v590_v49 = vmax.f32 %v1170_v44, 0.0  ;;  %v1173_v50 = vadd.f32 %v1019_v48, %v903_v10  ;;  %597 = sbr.rel (%p904_p5) target bundleno = 239 (0xef), region = 44 }
  0xe3   : > { %v460_v51 = vpop.f32.mrf.mxu0  ;;  %v492_v54 = vpop.f32.mrf.mxu1 }
  0xe4   : > { %v585_v52 = vmax.f32 %v569_v47, 0.0  ;;  %v567_v53 = vadd.f32 %v903_v10, %v460_v51  ;;  %v593_v55 = vmax.f32 %v1173_v50, 0.0  ;;  %v575_v56 = vadd.f32 %v903_v10, %v492_v54 }
  0xe6   : > { %v583_v57 = vmax.f32 %v567_v53, 0.0  ;;  %v591_v58 = vmax.f32 %v575_v56, 0.0 }
  0xe7   : > { %598 = vst [vmem:[#allocation3 + $0x30] sm:$0xff] %v578_v22  ;;  %599 = vst [vmem:[#allocation3] sm:$0xff] %v579_v34 }
  0xe8   : > { %600 = vst [vmem:[#allocation3 + $0x58] sm:$0xff] %v580_v16  ;;  %601 = vst [vmem:[#allocation3 + $0x18] sm:$0xff] %v581_v28 }
  0xe9   : > { %602 = vst [vmem:[#allocation3 + $0x50] sm:$0xff] %v582_v46  ;;  %603 = vst [vmem:[#allocation3 + $0x68] sm:$0xff] %v583_v57 }
  0xea   : > { %604 = vst [vmem:[#allocation3 + $0x8] sm:$0xff] %v584_v40  ;;  %605 = vst [vmem:[#allocation3 + $0x48] sm:$0xff] %v585_v52 }
  0xeb   : > { %606 = vst [vmem:[#allocation3 + $0x40] sm:$0xff] %v586_v25  ;;  %607 = vst [vmem:[#allocation3 + $0x20] sm:$0xff] %v587_v37 }
  0xec   : > { %608 = vst [vmem:[#allocation3 + $0x10] sm:$0xff] %v588_v19  ;;  %609 = vst [vmem:[#allocation3 + $0x38] sm:$0xff] %v589_v31 }
  0xed   : > { %610 = vst [vmem:[#allocation3 + $0x60] sm:$0xff] %v590_v49  ;;  %611 = vst [vmem:[#allocation3 + $0x70] sm:$0xff] %v591_v58 }
  0xee   : > { %612 = vst [vmem:[#allocation3 + $0x78] sm:$0xff] %v592_v43  ;;  %613 = vst [vmem:[#allocation3 + $0x28] sm:$0xff] %v593_v55 }
  0xef PF: > { %p905_p6 = scmp.le.s32.totalorder %s1072_s12, 0 }
  0xf1   : > { %617 = sbr.rel (%p905_p6) target bundleno = 257 (0x101), region = 48 }
  0xf6   : > { %v618_v59 = vld [vmem:[#allocation3 + $0x30] sm:$0xff]  ;;  %v619_v60 = vld [vmem:[#allocation3] sm:$0xff]  ;;  %v620_v61 = vld [vmem:[#allocation3 + $0x58] sm:$0xff] }
  0xf7   : > { %v634_v62 = vmax.f32 %v618_v59, %v578_v22  ;;  %v635_v63 = vmax.f32 %v619_v60, %v579_v34  ;;  %v636_v0 = vmax.f32 %v620_v61, %v580_v16  ;;  %v621_v1 = vld [vmem:[#allocation3 + $0x18] sm:$0xff]  ;;  %v622_v2 = vld [vmem:[#allocation3 + $0x50] sm:$0xff]  ;;  %v623_v3 = vld [vmem:[#allocation3 + $0x68] sm:$0xff] }
  0xf8   : > { %v637_v4 = vmax.f32 %v621_v1, %v581_v28  ;;  %v638_v5 = vmax.f32 %v622_v2, %v582_v46  ;;  %v639_v6 = vmax.f32 %v623_v3, %v583_v57  ;;  %v624_v7 = vld [vmem:[#allocation3 + $0x8] sm:$0xff]  ;;  %v626_v9 = vld [vmem:[#allocation3 + $0x40] sm:$0xff]  ;;  %v628_v12 = vld [vmem:[#allocation3 + $0x10] sm:$0xff] }
  0xf9   : > { %v625_v8 = vld [vmem:[#allocation3 + $0x48] sm:$0xff]  ;;  %650 = vst [vmem:[#allocation3 + $0x30] sm:$0xff] %v634_v62  ;;  %651 = vst [vmem:[#allocation3] sm:$0xff] %v635_v63  ;;  %v640_v10 = vmax.f32 %v624_v7, %v584_v40  ;;  %v642_v13 = vmax.f32 %v626_v9, %v586_v25  ;;  %v627_v15 = vld [vmem:[#allocation3 + $0x20] sm:$0xff]  ;;  %v644_v18 = vmax.f32 %v628_v12, %v588_v19 }
  0xfa   : > { %652 = vst [vmem:[#allocation3 + $0x58] sm:$0xff] %v636_v0  ;;  %v641_v11 = vmax.f32 %v625_v8, %v585_v52  ;;  %v629_v16 = vld [vmem:[#allocation3 + $0x38] sm:$0xff]  ;;  %653 = vst [vmem:[#allocation3 + $0x18] sm:$0xff] %v637_v4  ;;  %v643_v17 = vmax.f32 %v627_v15, %v587_v37  ;;  %v630_v22 = vld [vmem:[#allocation3 + $0x60] sm:$0xff] }
  0xfb   : > { %654 = vst [vmem:[#allocation3 + $0x50] sm:$0xff] %v638_v5  ;;  %655 = vst [vmem:[#allocation3 + $0x68] sm:$0xff] %v639_v6  ;;  %v645_v21 = vmax.f32 %v629_v16, %v589_v31  ;;  %v631_v23 = vld [vmem:[#allocation3 + $0x70] sm:$0xff]  ;;  %v632_v24 = vld [vmem:[#allocation3 + $0x78] sm:$0xff]  ;;  %v646_v20 = vmax.f32 %v630_v22, %v590_v49 }
  0xfc   : > { %656 = vst [vmem:[#allocation3 + $0x8] sm:$0xff] %v640_v10  ;;  %657 = vst [vmem:[#allocation3 + $0x48] sm:$0xff] %v641_v11  ;;  %v647_v25 = vmax.f32 %v631_v23, %v591_v58  ;;  %v648_v27 = vmax.f32 %v632_v24, %v592_v43  ;;  %v633_v28 = vld [vmem:[#allocation3 + $0x28] sm:$0xff] }
  0xfd   : > { %658 = vst [vmem:[#allocation3 + $0x40] sm:$0xff] %v642_v13  ;;  %659 = vst [vmem:[#allocation3 + $0x20] sm:$0xff] %v643_v17  ;;  %v649_v14 = vmax.f32 %v633_v28, %v593_v55 }
  0xfe   : > { %660 = vst [vmem:[#allocation3 + $0x10] sm:$0xff] %v644_v18  ;;  %661 = vst [vmem:[#allocation3 + $0x38] sm:$0xff] %v645_v21 }
  0xff   : > { %662 = vst [vmem:[#allocation3 + $0x60] sm:$0xff] %v646_v20  ;;  %663 = vst [vmem:[#allocation3 + $0x70] sm:$0xff] %v647_v25 }
 0x100   : > { %664 = vst [vmem:[#allocation3 + $0x78] sm:$0xff] %v648_v27  ;;  %665 = vst [vmem:[#allocation3 + $0x28] sm:$0xff] %v649_v14 }
 0x101 PF: > { %p906_p7 = scmp.ne.s32.totalorder %s1072_s12, 3 }
 0x103   : > { %669 = sbr.rel (%p906_p7) target bundleno = 273 (0x111), region = 52 }
 0x108   : > { %v670_v19 = vld [vmem:[#allocation3 + $0x30] sm:$0xff]  ;;  %v671_v26 = vld [vmem:[#allocation3] sm:$0xff]  ;;  %v672_v29 = vld [vmem:[#allocation3 + $0x58] sm:$0xff] }
 0x109   : > { %v946_v30 = vpack.c.bf16 %v671_v26, %v670_v19  ;;  %v673_v31 = vld [vmem:[#allocation3 + $0x18] sm:$0xff]  ;;  %v674_v32 = vld [vmem:[#allocation3 + $0x50] sm:$0xff]  ;;  %v675_v33 = vld [vmem:[#allocation3 + $0x68] sm:$0xff] }
 0x10a   : > { %v951_v34 = vpack.c.bf16 %v673_v31, %v672_v29  ;;  %v956_v35 = vpack.c.bf16 %v675_v33, %v674_v32  ;;  %v676_v36 = vld [vmem:[#allocation3 + $0x8] sm:$0xff]  ;;  %v678_v38 = vld [vmem:[#allocation3 + $0x40] sm:$0xff]  ;;  %v680_v41 = vld [vmem:[#allocation3 + $0x10] sm:$0xff] }
 0x10b   : > { %v677_v37 = vld [vmem:[#allocation3 + $0x48] sm:$0xff]  ;;  %947 = vst [vmem:[%s1247_s3] sm:$0xff] %v946_v30   ;;  %v679_v40 = vld [vmem:[#allocation3 + $0x20] sm:$0xff]  ;;  %v681_v42 = vld [vmem:[#allocation3 + $0x38] sm:$0xff] }
 0x10c   : > { %v961_v39 = vpack.c.bf16 %v677_v37, %v676_v36  ;;  %983 = vst [vmem:[%s1247_s3 + $0x8] sm:$0xff] %v951_v34   ;;  %984 = vst [vmem:[%s1247_s3 + $0x10] sm:$0xff] %v956_v35   ;;  %v966_v43 = vpack.c.bf16 %v679_v40, %v678_v38  ;;  %v971_v44 = vpack.c.bf16 %v681_v42, %v680_v41  ;;  %v682_v45 = vld [vmem:[#allocation3 + $0x60] sm:$0xff]  ;;  %v683_v46 = vld [vmem:[#allocation3 + $0x70] sm:$0xff] }
 0x10d   : > { %v684_v47 = vld [vmem:[#allocation3 + $0x78] sm:$0xff]  ;;  %v976_v48 = vpack.c.bf16 %v683_v46, %v682_v45  ;;  %v685_v49 = vld [vmem:[#allocation3 + $0x28] sm:$0xff] }
 0x10e   : > { %985 = vst [vmem:[%s1247_s3 + $0x18] sm:$0xff] %v961_v39   ;;  %986 = vst [vmem:[%s1247_s3 + $0x20] sm:$0xff] %v966_v43   ;;  %v981_v50 = vpack.c.bf16 %v685_v49, %v684_v47 }
 0x10f   : > { %987 = vst [vmem:[%s1247_s3 + $0x28] sm:$0xff] %v971_v44   ;;  %988 = vst [vmem:[%s1247_s3 + $0x30] sm:$0xff] %v976_v48  }
 0x110   : > { %989 = vst [vmem:[%s1247_s3 + $0x38] sm:$0xff] %v981_v50  }
 0x111 PF: > { %s13_s14 = sadd.s32 1, %s1080_s14   ;;  %s1248_s12 = smov %s1076_s13 }
 0x112   : > { %p10_p8 = scmp.ge.s32.totalorder %s13_s14, 6   ;;  %s1249_s13 = smov %s1251_s15 }
 0x114   :  { %12 = sbr.rel (!%p10_p8) target bundleno = 2 (0x2), region = 88 }

// kernel: ppo_forward.6
= control target key start
LH: loop header
LB: loop body
LE: loop exit
PB: predicated region body
PF: predicated region fallthrough
CT: control target
= control target key end

     0   :  { %s1270_s12 = smov 0   ;;  %s1272_s13 = smov 0   ;;  %s1435_s0 = inlined_call_operand.vmem [shape: bf16[128,576], index: 0, kind: input, shape index: {}]   ;;  %s1436_s1 = inlined_call_operand.vmem [shape: bf16[576,128], index: 1, kind: input, shape index: {}]   ;;  %s1437_s2 = inlined_call_operand.vmem [shape: f32[1,128], index: 2, kind: input, shape index: {}]   ;;  %s1438_s3 = inlined_call_operand.vmem [shape: bf16[32,128], index: 3, kind: output, shape index: {}]  }
   0x1   :  { %s1274_s14 = smov 0  }
   0x2 LB: > { %s31_s15 = sadd.s32 1, %s1244_s13  ;;  %p999_p0 = scmp.ge.s32.totalorder %s1248_s14, 1  ;;  %s1248_s14 = sphi %s1274_s14, %s13_s14   ;;  %s1244_s13 = sphi %s1272_s13, %s1440_s13   ;;  %s1240_s12 = sphi %s1270_s12, %s1439_s12  }
   0x3   : > { %p33_p1 = scmp.ge.s32.totalorder %s31_s15, 4  ;;  %p202_p2 = scmp.lt.s32.totalorder %s1248_s14, 5 }
   0x5   : > { %s1442_s15 = smov (%p33_p1, %s31_s15), 0  ;;  %p203_p3 = pnand %p999_p0, %p202_p2 }
   0x6   : > { %s1000_s23 = sshll.u32 (!%p203_p3), %s1240_s12, 2  ;;  %p1051_p5 = scmp.ne.s32.totalorder (!%p203_p3), %s1240_s12, 0 }
   0x7   : > { %206 = sbr.rel (%p203_p3) target bundleno = 293 (0x125), region = 32  ;;  %p249_p4 = scmp.lt.s32.totalorder (!%p203_p3), %s1000_s23, 15 }
   0xc   : > { %v1176_v0 = vld [vmem:[%s1436_s1 + $0x78] sm:$0xff]   ;;  %v1180_v4 = vld [vmem:[%s1436_s1 + $0x70] sm:$0xff]   ;;  %v1184_v8 = vld [vmem:[%s1436_s1 + $0x68] sm:$0xff]   ;;  %s1444_s23 = smov (!%p249_p4, %s1000_s23), 15  ;;  %vm644_vm0 = vcmask 523264  }
   0xd   : > { %v1177_v1 = vld [vmem:[%s1436_s1 + $0xf8] sm:$0xff]   ;;  %1077 = vmatprep.subr.bf16.mxu0 %v1176_v0  ;;  %v1181_v5 = vld [vmem:[%s1436_s1 + $0xf0] sm:$0xff]   ;;  %v1185_v9 = vld [vmem:[%s1436_s1 + $0xe8] sm:$0xff]   ;;  %s1151_s24 = smul.u32 20, %s1444_s23 }
   0xe   : > { %v1178_v2 = vld [vmem:[%s1436_s1 + $0x38] sm:$0xff]   ;;  %1105 = vmatprep.subr.bf16.mxu1 %v1177_v1  ;;  %v1182_v6 = vld [vmem:[%s1436_s1 + $0x30] sm:$0xff]   ;;  %v1186_v10 = vld [vmem:[%s1436_s1 + $0x28] sm:$0xff]  }
   0xf   : > { %v1179_v3 = vld [vmem:[%s1436_s1 + $0xb8] sm:$0xff]   ;;  %1078 = vmatpush3.bf16.msra.mxu0 %v1178_v2  ;;  %v1183_v7 = vld [vmem:[%s1436_s1 + $0xb0] sm:$0xff]   ;;  %v1187_v11 = vld [vmem:[%s1436_s1 + $0xa8] sm:$0xff]   ;;  %s1384_s7 = scalar_lea.vmem %s1435_s0, %s1151_s24 }
  0x10   : > { %1106 = vmatpush3.bf16.msra.mxu1 %v1179_v3  ;;  %1079 = vmatprep.subr.bf16.mxu0 %v1180_v4  ;;  %v1188_v12 = vld [vmem:[%s1436_s1 + $0x60] sm:$0xff]   ;;  %v1192_v16 = vld [vmem:[%s1436_s1 + $0x58] sm:$0xff]   ;;  %v1196_v20 = vld [vmem:[%s1436_s1 + $0x50] sm:$0xff]  }
  0x11   : > { %1107 = vmatprep.subr.bf16.mxu1 %v1181_v5  ;;  %v1189_v13 = vld [vmem:[%s1436_s1 + $0xe0] sm:$0xff]   ;;  %v1193_v17 = vld [vmem:[%s1436_s1 + $0xd8] sm:$0xff]   ;;  %v1197_v21 = vld [vmem:[%s1436_s1 + $0xd0] sm:$0xff]  }
  0x12   : > { %v1190_v14 = vld [vmem:[%s1436_s1 + $0x20] sm:$0xff]   ;;  %v1194_v18 = vld [vmem:[%s1436_s1 + $0x18] sm:$0xff]   ;;  %v1198_v22 = vld [vmem:[%s1436_s1 + $0x10] sm:$0xff]  }
  0x13   : > { %1080 = vmatpush3.bf16.msra.mxu0 %v1182_v6  ;;  %v1191_v15 = vld [vmem:[%s1436_s1 + $0xa0] sm:$0xff]   ;;  %v1195_v19 = vld [vmem:[%s1436_s1 + $0x98] sm:$0xff]   ;;  %v1199_v23 = vld [vmem:[%s1436_s1 + $0x90] sm:$0xff]  }
  0x14   : > { %1108 = vmatpush3.bf16.msra.mxu1 %v1183_v7  ;;  %1081 = vmatprep.subr.bf16.mxu0 %v1184_v8  ;;  %v1200_v24 = vld [vmem:[%s1436_s1 + $0x48] sm:$0xff]   ;;  %v1204_v28 = vld [vmem:[%s1436_s1 + $0x40] sm:$0xff]   ;;  %v1214_v36 = vld [vmem:[%s1436_s1 + $0x118] sm:$0xff]  }
  0x15   : > { %1109 = vmatprep.subr.bf16.mxu1 %v1185_v9  ;;  %v1201_v25 = vld [vmem:[%s1436_s1 + $0xc8] sm:$0xff]   ;;  %v1205_v29 = vld [vmem:[%s1436_s1 + $0xc0] sm:$0xff]   ;;  %v1215_v37 = vld [vmem:[%s1436_s1 + $0x110] sm:$0xff]  }
  0x16   : > { %v1202_v26 = vld [vmem:[%s1436_s1 + $0x8] sm:$0xff]   ;;  %v1206_v30 = vld [vmem:[%s1436_s1] sm:$0xff]  }
  0x17   : > { %1082 = vmatpush3.bf16.msra.mxu0 %v1186_v10  ;;  %v1203_v27 = vld [vmem:[%s1436_s1 + $0x88] sm:$0xff]   ;;  %v1207_v31 = vld [vmem:[%s1436_s1 + $0x80] sm:$0xff]  }
  0x18   : > { %1110 = vmatpush3.bf16.msra.mxu1 %v1187_v11  ;;  %1083 = vmatprep.subr.bf16.mxu0 %v1188_v12  ;;  %v1208_v32 = vld [vmem:[%s1384_s7] ss:$20 sps:$4 sm:$0xff]   ;;  %v1210_v33 = vld [vmem:[%s1384_s7 + $0x4] ss:$20 sps:$4 sm:$0xff]   ;;  %v1211_v34 = vld [vmem:[%s1384_s7 + $0x8] ss:$20 sps:$4 sm:$0xff]  }
  0x19   : > { %1111 = vmatprep.subr.bf16.mxu1 %v1189_v13  ;;  %v1213_v35 = vld [vmem:[%s1384_s7 + $0xc] ss:$20 sps:$4 sm:$0xff]   ;;  %683 = vmatprep.mubr.bf16.mxu0 %v1210_v33  ;;  %v1218_v39 = vld [vmem:[%s1384_s7 + $0x34] ss:$20 sps:$4 sm:$0xff]   ;;  %v1221_v42 = vld [vmem:[%s1384_s7 + $0x30] ss:$20 sps:$4 sm:$0xff]  }
  0x1a   : > { %732 = vmatprep.mubr.bf16.mxu1 %v1213_v35  ;;  %v1216_v38 = vld [vmem:[%s1384_s7 + $0x2c] ss:$20 sps:$4 sm:$0xff]   ;;  %v1220_v40 = vld [vmem:[%s1384_s7 + $0x28] ss:$20 sps:$4 sm:$0xff]   ;;  %v1224_v43 = vld [vmem:[%s1384_s7 + $0x10] ss:$20 sps:$4 sm:$0xff]  }
  0x1b   : > { %1084 = vmatpush3.bf16.msra.mxu0 %v1190_v14  ;;  %v1222_v41 = vld [vmem:[%s1436_s1 + $0x108] sm:$0xff]   ;;  %v1223_v44 = vld [vmem:[%s1436_s1 + $0x100] sm:$0xff]  }
  0x1c   : > { %1112 = vmatpush3.bf16.msra.mxu1 %v1191_v15  ;;  %1085 = vmatprep.subr.bf16.mxu0 %v1192_v16  ;;  %v1225_v45 = vld [vmem:[%s1384_s7 + $0x38] ss:$20 sps:$4 sm:$0xff]   ;;  %v1050_v6 = vld [vmem:[%s1437_s2] ss:$0 sm:$0xff] }
  0x1d   : > { %1113 = vmatprep.subr.bf16.mxu1 %v1193_v17 }
  0x1f   : > { %1086 = vmatpush3.bf16.msra.mxu0 %v1194_v18 }
  0x20   : > { %1114 = vmatpush3.bf16.msra.mxu1 %v1195_v19  ;;  %1087 = vmatprep.subr.bf16.mxu0 %v1196_v20 }
  0x21   : > { %1115 = vmatprep.subr.bf16.mxu1 %v1197_v21 }
  0x23   : > { %1088 = vmatpush3.bf16.msra.mxu0 %v1198_v22 }
  0x24   : > { %1116 = vmatpush3.bf16.msra.mxu1 %v1199_v23  ;;  %1089 = vmatprep.subr.bf16.mxu0 %v1200_v24 }
  0x25   : > { %1117 = vmatprep.subr.bf16.mxu1 %v1201_v25 }
  0x27   : > { %1090 = vmatpush3.bf16.msra.mxu0 %v1202_v26 }
  0x28   : > { %1118 = vmatpush3.bf16.msra.mxu1 %v1203_v27  ;;  %1091 = vmatprep.subr.bf16.mxu0 %v1204_v28 }
  0x29   : > { %1119 = vmatprep.subr.bf16.mxu1 %v1205_v29 }
  0x2b   : > { %1092 = vmatpush3.bf16.msra.mxu0 %v1206_v30 }
  0x2c   : > { %1120 = vmatpush3.bf16.msra.mxu1 %v1207_v31  ;;  %1139 = vmatprep.subr.bf16.mxu0 %v1214_v36 }
  0x2e   : > { %684 = vmatmul.mubr.bf16.vlgmr.msra.gmra.mxu0 %v1208_v32 }
  0x2f   : > { %733 = vmatmul.mubr.bf16.vlgmr.msra.gmra.mxu1 %v1211_v34  ;;  %1140 = vmatpush3.bf16.msra.mxu0 %v1214_v36 }
  0x30   : > { %1141 = vmatprep.subr.bf16.mxu0 %v1215_v37  ;;  %691 = vmatprep.mubr.bf16.mxu0 %v1216_v38 }
  0x31   : > { %740 = vmatprep.mubr.bf16.mxu1 %v1218_v39 }
  0x33   : > { %1142 = vmatpush3.bf16.msra.mxu0 %v1215_v37 }
  0x34   : > { %1143 = vmatprep.subr.bf16.mxu0 %v1222_v41 }
  0x36   : > { %692 = vmatmul.mubr.bf16.gmra.mxu0 %v1220_v40 }
  0x37   : > { %741 = vmatmul.mubr.bf16.gmra.mxu1 %v1221_v42  ;;  %1147 = vmatprep.mubr.msk.bf16.mxu0 %vm644_vm0, %v1224_v43 }
  0x38   : > { %1144 = vmatpush3.bf16.msra.mxu0 %v1222_v41 }
  0x39   : > { %1145 = vmatprep.subr.bf16.mxu0 %v1223_v44 }
  0x3c   : > { %1146 = vmatpush3.bf16.msra.mxu0 %v1223_v44 }
  0x3f   : > { %1148 = vmatmul.mubr.msk.bf16.vlgmr.msra.gmra.mxu0 %vm644_vm0, %v1225_v45 }
  0xee   : > { %v1093_v46 = vpop.f32.mrf.mxu0 }
  0xef   : > { %v1121_v47 = vpop.f32.mrf.mxu1 }
  0xf0   : > { %v1094_v48 = vpop.f32.mrf.mxu0 }
  0xf1   : > { %v1122_v49 = vpop.f32.mrf.mxu1  ;;  %v1095_v62 = vadd.f32 %v1094_v48, %v1093_v46 }
  0xf2   : > { %v1096_v50 = vpop.f32.mrf.mxu0  ;;  %v1123_v63 = vadd.f32 %v1122_v49, %v1121_v47 }
  0xf3   : > { %v1124_v51 = vpop.f32.mrf.mxu1 }
  0xf4   : > { %v1097_v52 = vpop.f32.mrf.mxu0  ;;  %v735_v10 = vadd.f32 %v1123_v63, %v1095_v62 }
  0xf5   : > { %v1125_v53 = vpop.f32.mrf.mxu1  ;;  %v1098_v7 = vadd.f32 %v1097_v52, %v1096_v50 }
  0xf6   : > { %v1099_v54 = vpop.f32.mrf.mxu0  ;;  %v1126_v8 = vadd.f32 %v1125_v53, %v1124_v51 }
  0xf7   : > { %v1127_v55 = vpop.f32.mrf.mxu1 }
  0xf8   : > { %v1100_v56 = vpop.f32.mrf.mxu0  ;;  %v738_v19 = vadd.f32 %v1126_v8, %v1098_v7 }
  0xf9   : > { %v1128_v57 = vpop.f32.mrf.mxu1  ;;  %v1101_v58 = vadd.f32 %v1100_v56, %v1099_v54 }
  0xfa   : > { %v1129_v59 = vadd.f32 %v1128_v57, %v1127_v55  ;;  %v1102_v60 = vpop.f32.mrf.mxu0 }
  0xfb   : > { %v1130_v61 = vpop.f32.mrf.mxu1 }
  0xfc   : > { %v1103_v0 = vpop.f32.mrf.mxu0  ;;  %v743_v4 = vadd.f32 %v1129_v59, %v1101_v58 }
  0xfd   : > { %v1131_v1 = vpop.f32.mrf.mxu1  ;;  %v1104_v2 = vadd.f32 %v1103_v0, %v1102_v60 }
  0xfe   : > { %v1132_v3 = vadd.f32 %v1131_v1, %v1130_v61 }
  0xff   : > { %v1149_v5 = vpop.f32.mrf.mxu0 }
 0x100   : > { %v792_v9 = vadd.f32 %v1149_v5, %v743_v4  ;;  %v746_v14 = vadd.f32 %v1132_v3, %v1104_v2 }
 0x101   : > { %v783_v11 = vpop.f32.mrf.mxu0 }
 0x102   : > { %v822_v12 = vadd.f32 %v1050_v6, %v792_v9  ;;  %v784_v13 = vadd.f32 %v783_v11, %v735_v10 }
 0x103   : > { %v1150_v15 = vpop.f32.mrf.mxu0 }
 0x104   : > { %v826_v16 = vmax.f32 %v822_v12, 0.0  ;;  %v820_v17 = vadd.f32 %v1050_v6, %v784_v13  ;;  %v795_v18 = vadd.f32 %v1150_v15, %v746_v14 }
 0x105   : > { %v786_v20 = vpop.f32.mrf.mxu0 }
 0x106   : > { %v824_v21 = vmax.f32 %v820_v17, 0.0  ;;  %v823_v22 = vadd.f32 %v1050_v6, %v795_v18  ;;  %v787_v23 = vadd.f32 %v786_v20, %v738_v19  ;;  %831 = sbr.rel (%p1051_p5) target bundleno = 269 (0x10d), region = 44 }
 0x108   : > { %v827_v24 = vmax.f32 %v823_v22, 0.0  ;;  %v821_v25 = vadd.f32 %v1050_v6, %v787_v23 }
 0x10a   : > { %v825_v26 = vmax.f32 %v821_v25, 0.0 }
 0x10b   : > { %832 = vst [vmem:[#allocation3 + $0x10] sm:$0xff] %v824_v21  ;;  %834 = vst [vmem:[#allocation3 + $0x18] sm:$0xff] %v826_v16 }
 0x10c   : > { %833 = vst [vmem:[#allocation3] sm:$0xff] %v825_v26  ;;  %835 = vst [vmem:[#allocation3 + $0x8] sm:$0xff] %v827_v24 }
 0x10d PF: > { %p1052_p6 = scmp.le.s32.totalorder %s1240_s12, 0 }
 0x10f   : > { %839 = sbr.rel (%p1052_p6) target bundleno = 281 (0x119), region = 48 }
 0x114   : > { %v840_v27 = vld [vmem:[#allocation3 + $0x10] sm:$0xff]  ;;  %v841_v28 = vld [vmem:[#allocation3] sm:$0xff]  ;;  %v842_v29 = vld [vmem:[#allocation3 + $0x18] sm:$0xff] }
 0x115   : > { %v844_v30 = vmax.f32 %v840_v27, %v824_v21  ;;  %v845_v31 = vmax.f32 %v841_v28, %v825_v26  ;;  %v846_v32 = vmax.f32 %v842_v29, %v826_v16  ;;  %v843_v33 = vld [vmem:[#allocation3 + $0x8] sm:$0xff] }
 0x116   : > { %v847_v34 = vmax.f32 %v843_v33, %v827_v24 }
 0x117   : > { %848 = vst [vmem:[#allocation3 + $0x10] sm:$0xff] %v844_v30  ;;  %849 = vst [vmem:[#allocation3] sm:$0xff] %v845_v31 }
 0x118   : > { %850 = vst [vmem:[#allocation3 + $0x18] sm:$0xff] %v846_v32  ;;  %851 = vst [vmem:[#allocation3 + $0x8] sm:$0xff] %v847_v34 }
 0x119 PF: > { %p1053_p7 = scmp.ne.s32.totalorder %s1240_s12, 3 }
 0x11b   : > { %855 = sbr.rel (%p1053_p7) target bundleno = 293 (0x125), region = 52 }
 0x120   : > { %v856_v35 = vld [vmem:[#allocation3 + $0x10] sm:$0xff]  ;;  %v857_v36 = vld [vmem:[#allocation3] sm:$0xff]  ;;  %v858_v37 = vld [vmem:[#allocation3 + $0x18] sm:$0xff] }
 0x121   : > { %v1069_v38 = vpack.c.bf16 %v857_v36, %v856_v35  ;;  %v859_v39 = vld [vmem:[#allocation3 + $0x8] sm:$0xff] }
 0x122   : > { %v1074_v40 = vpack.c.bf16 %v859_v39, %v858_v37 }
 0x123   : > { %1070 = vst [vmem:[%s1438_s3] sm:$0xff] %v1069_v38  }
 0x124   : > { %1076 = vst [vmem:[%s1438_s3 + $0x8] sm:$0xff] %v1074_v40  }
 0x125 PF: > { %s13_s14 = sadd.s32 1, %s1248_s14   ;;  %s1439_s12 = smov %s1244_s13 }
 0x126   : > { %p10_p8 = scmp.ge.s32.totalorder %s13_s14, 6   ;;  %s1440_s13 = smov %s1442_s15 }
 0x128   :  { %12 = sbr.rel (!%p10_p8) target bundleno = 2 (0x2), region = 88 }

// kernel: ppo_forward.9
= control target key start
LH: loop header
LB: loop body
LE: loop exit
PB: predicated region body
PF: predicated region fallthrough
CT: control target
= control target key end

     0   :  { %v211_v0 = vmov 0.0   ;;  %vm212_vm0 = vmmov 0   ;;  %vm84_vm1 = vcmask 523264   ;;  %s257_s1 = inlined_call_operand.vmem [shape: bf16[64,128], index: 1, kind: input, shape index: {}]   ;;  %s258_s0 = inlined_call_operand.vmem [shape: bf16[16,64], index: 0, kind: input, shape index: {}]   ;;  %s259_s2 = inlined_call_operand.vmem [shape: f32[1,128], index: 2, kind: input, shape index: {}]   ;;  %s260_s3 = inlined_call_operand.vmem [shape: f32[16,128], index: 3, kind: output, shape index: {}]  }
   0x1   :  { %192 = vmatprep.subr.bf16.mxu0 %v211_v0  ;;  %v206_v1 = vld [vmem:[%s257_s1 + $0x18] sm:$0xff]   ;;  %200 = vmatprep.mubr.msk.bf16.mxu0 %vm212_vm0, %v211_v0  ;;  %v207_v2 = vld [vmem:[%s257_s1 + $0x10] sm:$0xff]   ;;  %v208_v3 = vld [vmem:[%s257_s1 + $0x8] sm:$0xff]  }
   0x2   :  { %193 = vmatpush3.bf16.msra.mxu0 %v206_v1  ;;  %v209_v4 = vld [vmem:[%s257_s1] sm:$0xff]  }
   0x3   :  { %194 = vmatprep.subr.bf16.mxu0 %v211_v0  ;;  %v210_v5 = vld [vmem:[%s258_s0] sm:$0xff]  }
   0x4   :  { %v186_v6 = vld [vmem:[%s259_s2] ss:$0 sm:$0xff] }
   0x6   :  { %195 = vmatpush3.bf16.msra.mxu0 %v207_v2 }
   0x7   :  { %196 = vmatprep.subr.bf16.mxu0 %v211_v0 }
   0xa   :  { %197 = vmatpush3.bf16.msra.mxu0 %v208_v3 }
   0xb   :  { %198 = vmatprep.subr.bf16.mxu0 %v211_v0 }
   0xe   :  { %199 = vmatpush3.bf16.msra.mxu0 %v209_v4 }
  0x11   :  { %201 = vmatmul.mubr.msk.bf16.vlgmr.msra.gmra.mxu0 %vm84_vm1, %v210_v5 }
  0xd1   :  { %v122_v7 = vpop.f32.mrf.mxu0 }
  0xd2   :  { %v145_v8 = vadd.f32 %v186_v6, %v122_v7 }
  0xd3   :  { %v202_v9 = vpop.f32.mrf.mxu0 }
  0xd4   :  { %168 = vst [vmem:[%s260_s3] sm:$0xff] %v145_v8 }
  0xd5   :  { %v125_v10 = vpop.f32.mrf.mxu0 }
  0xd6   :  { %v146_v11 = vadd.f32 %v186_v6, %v125_v10 }
  0xd7   :  { %v203_v12 = vpop.f32.mrf.mxu0 }
  0xd8   :  { %169 = vst [vmem:[%s260_s3 + $0x8] sm:$0xff] %v146_v11 }

// kernel: ppo_forward.7
= control target key start
LH: loop header
LB: loop body
LE: loop exit
PB: predicated region body
PF: predicated region fallthrough
CT: control target
= control target key end

     0   :  { %s2126_s12 = smov 0   ;;  %s2128_s13 = smov 0   ;;  %s2614_s0 = inlined_call_operand.vmem [shape: bf16[64,1152], index: 0, kind: input, shape index: {}]   ;;  %s2615_s1 = inlined_call_operand.vmem [shape: bf16[1152,256], index: 1, kind: input, shape index: {}]   ;;  %s2616_s2 = inlined_call_operand.vmem [shape: f32[1,256], index: 2, kind: input, shape index: {}]   ;;  %s2617_s3 = inlined_call_operand.vmem [shape: bf16[16,256], index: 3, kind: output, shape index: {}]  }
   0x1   :  { %s2130_s14 = smov 0  }
   0x2 LB: > { %s31_s15 = sadd.s32 1, %s2099_s13  ;;  %p1659_p0 = scmp.ge.s32.totalorder %s2103_s14, 1  ;;  %s2103_s14 = sphi %s2130_s14, %s13_s14   ;;  %s2099_s13 = sphi %s2128_s13, %s2619_s13   ;;  %s2095_s12 = sphi %s2126_s12, %s2618_s12  }
   0x3   : > { %p33_p1 = scmp.ge.s32.totalorder %s31_s15, 4  ;;  %p207_p2 = scmp.lt.s32.totalorder %s2103_s14, 5 }
   0x5   : > { %s2621_s15 = smov (%p33_p1, %s31_s15), 0  ;;  %p208_p3 = pnand %p1659_p0, %p207_p2 }
   0x6   : > { %s1660_s30 = sshll.u32 (!%p208_p3), %s2095_s12, 1  ;;  %p1815_p5 = scmp.ne.s32.totalorder (!%p208_p3), %s2095_s12, 0 }
   0x7   : > { %211 = sbr.rel (%p208_p3) target bundleno = 403 (0x193), region = 32  ;;  %p259_p4 = scmp.lt.s32.totalorder (!%p208_p3), %s1660_s30, 7 }
   0xc   : > { %v1852_v0 = vld [vmem:[%s2615_s1 + $0x74] ss:$8 sps:$4 sm:$0xff]   ;;  %v1856_v2 = vld [vmem:[%s2615_s1 + $0x70] ss:$8 sps:$4 sm:$0xff]   ;;  %v1858_v4 = vld [vmem:[%s2615_s1 + $0x64] ss:$8 sps:$4 sm:$0xff]  }
   0xd   : > { %v1854_v1 = vld [vmem:[%s2615_s1 + $0x174] ss:$8 sps:$4 sm:$0xff]   ;;  %1232 = vmatprep.subr.bf16.mxu0 %v1852_v0  ;;  %v1857_v3 = vld [vmem:[%s2615_s1 + $0x170] ss:$8 sps:$4 sm:$0xff]   ;;  %v1860_v5 = vld [vmem:[%s2615_s1 + $0x164] ss:$8 sps:$4 sm:$0xff]  }
   0xe   : > { %1275 = vmatprep.subr.bf16.mxu1 %v1854_v1  ;;  %1233 = vmatpush1.bf16.msra.mxu0 %v1856_v2  ;;  %v1862_v6 = vld [vmem:[%s2615_s1 + $0x60] ss:$8 sps:$4 sm:$0xff]   ;;  %v1864_v8 = vld [vmem:[%s2615_s1 + $0x54] ss:$8 sps:$4 sm:$0xff]   ;;  %v1868_v10 = vld [vmem:[%s2615_s1 + $0x50] ss:$8 sps:$4 sm:$0xff]  }
   0xf   : > { %1276 = vmatpush1.bf16.msra.mxu1 %v1857_v3  ;;  %1234 = vmatprep.subr.bf16.mxu0 %v1858_v4  ;;  %v1863_v7 = vld [vmem:[%s2615_s1 + $0x160] ss:$8 sps:$4 sm:$0xff]   ;;  %v1866_v9 = vld [vmem:[%s2615_s1 + $0x154] ss:$8 sps:$4 sm:$0xff]   ;;  %v1869_v11 = vld [vmem:[%s2615_s1 + $0x150] ss:$8 sps:$4 sm:$0xff]  }
  0x10   : > { %1277 = vmatprep.subr.bf16.mxu1 %v1860_v5  ;;  %v1870_v12 = vld [vmem:[%s2615_s1 + $0x44] ss:$8 sps:$4 sm:$0xff]   ;;  %v1874_v14 = vld [vmem:[%s2615_s1 + $0x40] ss:$8 sps:$4 sm:$0xff]   ;;  %v1876_v16 = vld [vmem:[%s2615_s1 + $0x34] ss:$8 sps:$4 sm:$0xff]  }
  0x11   : > { %v1872_v13 = vld [vmem:[%s2615_s1 + $0x144] ss:$8 sps:$4 sm:$0xff]   ;;  %v1875_v15 = vld [vmem:[%s2615_s1 + $0x140] ss:$8 sps:$4 sm:$0xff]   ;;  %v1878_v17 = vld [vmem:[%s2615_s1 + $0x134] ss:$8 sps:$4 sm:$0xff]  }
  0x12   : > { %1235 = vmatpush1.bf16.msra.mxu0 %v1862_v6  ;;  %v1880_v18 = vld [vmem:[%s2615_s1 + $0x30] ss:$8 sps:$4 sm:$0xff]   ;;  %v1882_v20 = vld [vmem:[%s2615_s1 + $0x24] ss:$8 sps:$4 sm:$0xff]   ;;  %v1886_v22 = vld [vmem:[%s2615_s1 + $0x20] ss:$8 sps:$4 sm:$0xff]  }
  0x13   : > { %1278 = vmatpush1.bf16.msra.mxu1 %v1863_v7  ;;  %1236 = vmatprep.subr.bf16.mxu0 %v1864_v8  ;;  %v1881_v19 = vld [vmem:[%s2615_s1 + $0x130] ss:$8 sps:$4 sm:$0xff]   ;;  %v1884_v21 = vld [vmem:[%s2615_s1 + $0x124] ss:$8 sps:$4 sm:$0xff]   ;;  %v1887_v23 = vld [vmem:[%s2615_s1 + $0x120] ss:$8 sps:$4 sm:$0xff]  }
  0x14   : > { %1279 = vmatprep.subr.bf16.mxu1 %v1866_v9  ;;  %v1888_v24 = vld [vmem:[%s2615_s1 + $0x14] ss:$8 sps:$4 sm:$0xff]   ;;  %v1892_v26 = vld [vmem:[%s2615_s1 + $0x10] ss:$8 sps:$4 sm:$0xff]   ;;  %v1894_v28 = vld [vmem:[%s2615_s1 + $0x4] ss:$8 sps:$4 sm:$0xff]  }
  0x15   : > { %v1890_v25 = vld [vmem:[%s2615_s1 + $0x114] ss:$8 sps:$4 sm:$0xff]   ;;  %v1893_v27 = vld [vmem:[%s2615_s1 + $0x110] ss:$8 sps:$4 sm:$0xff]   ;;  %v1896_v29 = vld [vmem:[%s2615_s1 + $0x104] ss:$8 sps:$4 sm:$0xff]  }
  0x16   : > { %1237 = vmatpush1.bf16.msra.mxu0 %v1868_v10  ;;  %v1898_v30 = vld [vmem:[%s2615_s1] ss:$8 sps:$4 sm:$0xff]   ;;  %v1900_v32 = vld [vmem:[%s2615_s1 + $0xf4] ss:$8 sps:$4 sm:$0xff]   ;;  %v1904_v34 = vld [vmem:[%s2615_s1 + $0xf0] ss:$8 sps:$4 sm:$0xff]  }
  0x17   : > { %1280 = vmatpush1.bf16.msra.mxu1 %v1869_v11  ;;  %1238 = vmatprep.subr.bf16.mxu0 %v1870_v12  ;;  %v1899_v31 = vld [vmem:[%s2615_s1 + $0x100] ss:$8 sps:$4 sm:$0xff]   ;;  %v1902_v33 = vld [vmem:[%s2615_s1 + $0x1f4] ss:$8 sps:$4 sm:$0xff]   ;;  %v1905_v35 = vld [vmem:[%s2615_s1 + $0x1f0] ss:$8 sps:$4 sm:$0xff]  }
  0x18   : > { %1281 = vmatprep.subr.bf16.mxu1 %v1872_v13  ;;  %v1906_v36 = vld [vmem:[%s2615_s1 + $0xe4] ss:$8 sps:$4 sm:$0xff]   ;;  %s2623_s30 = smov (!%p259_p4, %s1660_s30), 7  ;;  %v1910_v38 = vld [vmem:[%s2615_s1 + $0xe0] ss:$8 sps:$4 sm:$0xff]  }
  0x19   : > { %v1908_v37 = vld [vmem:[%s2615_s1 + $0x1e4] ss:$8 sps:$4 sm:$0xff]   ;;  %v1911_v39 = vld [vmem:[%s2615_s1 + $0x1e0] ss:$8 sps:$4 sm:$0xff]   ;;  %v1912_v40 = vld [vmem:[%s2615_s1 + $0xd4] ss:$8 sps:$4 sm:$0xff]  }
  0x1a   : > { %1239 = vmatpush1.bf16.msra.mxu0 %v1874_v14  ;;  %s1826_s4 = smul.u32 36, %s2623_s30  ;;  %v1914_v41 = vld [vmem:[%s2615_s1 + $0x1d4] ss:$8 sps:$4 sm:$0xff]   ;;  %v1916_v42 = vld [vmem:[%s2615_s1 + $0xd0] ss:$8 sps:$4 sm:$0xff]  }
  0x1b   : > { %1282 = vmatpush1.bf16.msra.mxu1 %v1875_v15  ;;  %1240 = vmatprep.subr.bf16.mxu0 %v1876_v16  ;;  %v1917_v43 = vld [vmem:[%s2615_s1 + $0x1d0] ss:$8 sps:$4 sm:$0xff]   ;;  %v1918_v44 = vld [vmem:[%s2615_s1 + $0xc4] ss:$8 sps:$4 sm:$0xff]   ;;  %v1922_v46 = vld [vmem:[%s2615_s1 + $0xc0] ss:$8 sps:$4 sm:$0xff]  }
  0x1c   : > { %1283 = vmatprep.subr.bf16.mxu1 %v1878_v17  ;;  %s2285_s18 = scalar_lea.vmem %s2614_s0, %s1826_s4  ;;  %v1920_v45 = vld [vmem:[%s2615_s1 + $0x1c4] ss:$8 sps:$4 sm:$0xff]   ;;  %v1923_v47 = vld [vmem:[%s2615_s1 + $0x1c0] ss:$8 sps:$4 sm:$0xff]   ;;  %v1924_v48 = vld [vmem:[%s2615_s1 + $0xb4] ss:$8 sps:$4 sm:$0xff]  }
  0x1d   : > { %v1950_v49 = vld [vmem:[%s2285_s18 + $0x4] ss:$36 sps:$4 sm:$0xff]   ;;  %v1926_v50 = vld [vmem:[%s2615_s1 + $0x1b4] ss:$8 sps:$4 sm:$0xff]   ;;  %v1953_v51 = vld [vmem:[%s2285_s18 + $0xc] ss:$36 sps:$4 sm:$0xff]  }
  0x1e   : > { %1241 = vmatpush1.bf16.msra.mxu0 %v1880_v18  ;;  %1264 = vmatprep.mubr.bf16.mxu0 %v1950_v49  ;;  %v1928_v52 = vld [vmem:[%s2615_s1 + $0xb0] ss:$8 sps:$4 sm:$0xff]   ;;  %v1930_v54 = vld [vmem:[%s2615_s1 + $0xa4] ss:$8 sps:$4 sm:$0xff]   ;;  %v1934_v56 = vld [vmem:[%s2615_s1 + $0xa0] ss:$8 sps:$4 sm:$0xff]  }
  0x1f   : > { %1284 = vmatpush1.bf16.msra.mxu1 %v1881_v19  ;;  %1242 = vmatprep.subr.bf16.mxu0 %v1882_v20  ;;  %v1929_v53 = vld [vmem:[%s2615_s1 + $0x1b0] ss:$8 sps:$4 sm:$0xff]   ;;  %v1932_v55 = vld [vmem:[%s2615_s1 + $0x1a4] ss:$8 sps:$4 sm:$0xff]   ;;  %v1935_v57 = vld [vmem:[%s2615_s1 + $0x1a0] ss:$8 sps:$4 sm:$0xff]  }
  0x20   : > { %1285 = vmatprep.subr.bf16.mxu1 %v1884_v21  ;;  %1307 = vmatprep.mubr.bf16.mxu1 %v1953_v51  ;;  %v1936_v58 = vld [vmem:[%s2615_s1 + $0x94] ss:$8 sps:$4 sm:$0xff]   ;;  %v1940_v60 = vld [vmem:[%s2615_s1 + $0x90] ss:$8 sps:$4 sm:$0xff]   ;;  %v1942_v62 = vld [vmem:[%s2615_s1 + $0x84] ss:$8 sps:$4 sm:$0xff]  }
  0x21   : > { %v1938_v59 = vld [vmem:[%s2615_s1 + $0x194] ss:$8 sps:$4 sm:$0xff]   ;;  %v1941_v61 = vld [vmem:[%s2615_s1 + $0x190] ss:$8 sps:$4 sm:$0xff]   ;;  %v1944_v63 = vld [vmem:[%s2615_s1 + $0x184] ss:$8 sps:$4 sm:$0xff]  }
  0x22   : > { %1243 = vmatpush1.bf16.msra.mxu0 %v1886_v22  ;;  %v1946_v0 = vld [vmem:[%s2615_s1 + $0x80] ss:$8 sps:$4 sm:$0xff]   ;;  %v1956_v2 = vld [vmem:[%s2615_s1 + $0x274] ss:$8 sps:$4 sm:$0xff]   ;;  %v1954_v6 = vld [vmem:[%s2615_s1 + $0x270] ss:$8 sps:$4 sm:$0xff]  }
  0x23   : > { %1286 = vmatpush1.bf16.msra.mxu1 %v1887_v23  ;;  %1244 = vmatprep.subr.bf16.mxu0 %v1888_v24  ;;  %v1947_v1 = vld [vmem:[%s2615_s1 + $0x180] ss:$8 sps:$4 sm:$0xff]   ;;  %v1959_v3 = vld [vmem:[%s2615_s1 + $0x374] ss:$8 sps:$4 sm:$0xff]   ;;  %v1957_v7 = vld [vmem:[%s2615_s1 + $0x370] ss:$8 sps:$4 sm:$0xff]  }
  0x24   : > { %1287 = vmatprep.subr.bf16.mxu1 %v1890_v25  ;;  %v1948_v4 = vld [vmem:[%s2285_s18] ss:$36 sps:$4 sm:$0xff]   ;;  %v1951_v5 = vld [vmem:[%s2285_s18 + $0x8] ss:$36 sps:$4 sm:$0xff]   ;;  %v1968_v12 = vld [vmem:[%s2615_s1 + $0x254] ss:$8 sps:$4 sm:$0xff]  }
  0x25   : > { %v1962_v8 = vld [vmem:[%s2615_s1 + $0x264] ss:$8 sps:$4 sm:$0xff]   ;;  %v1960_v10 = vld [vmem:[%s2615_s1 + $0x260] ss:$8 sps:$4 sm:$0xff]   ;;  %v1971_v13 = vld [vmem:[%s2615_s1 + $0x354] ss:$8 sps:$4 sm:$0xff]  }
  0x26   : > { %1245 = vmatpush1.bf16.msra.mxu0 %v1892_v26  ;;  %v1965_v9 = vld [vmem:[%s2615_s1 + $0x364] ss:$8 sps:$4 sm:$0xff]   ;;  %v1963_v11 = vld [vmem:[%s2615_s1 + $0x360] ss:$8 sps:$4 sm:$0xff]   ;;  %v1966_v14 = vld [vmem:[%s2615_s1 + $0x250] ss:$8 sps:$4 sm:$0xff]  }
  0x27   : > { %1288 = vmatpush1.bf16.msra.mxu1 %v1893_v27  ;;  %1246 = vmatprep.subr.bf16.mxu0 %v1894_v28  ;;  %v1969_v15 = vld [vmem:[%s2615_s1 + $0x350] ss:$8 sps:$4 sm:$0xff]   ;;  %v1974_v16 = vld [vmem:[%s2615_s1 + $0x244] ss:$8 sps:$4 sm:$0xff]   ;;  %v1972_v18 = vld [vmem:[%s2615_s1 + $0x240] ss:$8 sps:$4 sm:$0xff]  }
  0x28   : > { %1289 = vmatprep.subr.bf16.mxu1 %v1896_v29  ;;  %v1977_v17 = vld [vmem:[%s2615_s1 + $0x344] ss:$8 sps:$4 sm:$0xff]   ;;  %v1975_v19 = vld [vmem:[%s2615_s1 + $0x340] ss:$8 sps:$4 sm:$0xff]   ;;  %v1980_v20 = vld [vmem:[%s2615_s1 + $0x234] ss:$8 sps:$4 sm:$0xff]  }
  0x29   : > { %v1983_v21 = vld [vmem:[%s2615_s1 + $0x334] ss:$8 sps:$4 sm:$0xff]   ;;  %v1978_v22 = vld [vmem:[%s2615_s1 + $0x230] ss:$8 sps:$4 sm:$0xff]   ;;  %v1986_v24 = vld [vmem:[%s2615_s1 + $0x224] ss:$8 sps:$4 sm:$0xff]  }
  0x2a   : > { %1247 = vmatpush1.bf16.msra.mxu0 %v1898_v30  ;;  %v1981_v23 = vld [vmem:[%s2615_s1 + $0x330] ss:$8 sps:$4 sm:$0xff]   ;;  %v1989_v25 = vld [vmem:[%s2615_s1 + $0x324] ss:$8 sps:$4 sm:$0xff]   ;;  %v1984_v26 = vld [vmem:[%s2615_s1 + $0x220] ss:$8 sps:$4 sm:$0xff]  }
  0x2b   : > { %1290 = vmatpush1.bf16.msra.mxu1 %v1899_v31  ;;  %1248 = vmatprep.subr.bf16.mxu0 %v1900_v32  ;;  %v1987_v27 = vld [vmem:[%s2615_s1 + $0x320] ss:$8 sps:$4 sm:$0xff]   ;;  %v1992_v28 = vld [vmem:[%s2615_s1 + $0x214] ss:$8 sps:$4 sm:$0xff]   ;;  %v1990_v30 = vld [vmem:[%s2615_s1 + $0x210] ss:$8 sps:$4 sm:$0xff]  }
  0x2c   : > { %1291 = vmatprep.subr.bf16.mxu1 %v1902_v33  ;;  %v1995_v29 = vld [vmem:[%s2615_s1 + $0x314] ss:$8 sps:$4 sm:$0xff]   ;;  %v1993_v31 = vld [vmem:[%s2615_s1 + $0x310] ss:$8 sps:$4 sm:$0xff]   ;;  %v1998_v32 = vld [vmem:[%s2615_s1 + $0x204] ss:$8 sps:$4 sm:$0xff]  }
  0x2d   : > { %v2001_v33 = vld [vmem:[%s2615_s1 + $0x304] ss:$8 sps:$4 sm:$0xff]   ;;  %v2017_v49 = vld [vmem:[%s2615_s1 + $0x3d0] ss:$8 sps:$4 sm:$0xff]  }
  0x2e   : > { %1249 = vmatpush2.bf16.msra.mxu0 %v1904_v34  ;;  %v2052_v34 = vld [vmem:[%s2285_s18 + $0x14] ss:$36 sps:$4 sm:$0xff]   ;;  %v2025_v51 = vld [vmem:[%s2615_s1 + $0x3c4] ss:$8 sps:$4 sm:$0xff]  }
  0x2f   : > { %1292 = vmatpush2.bf16.msra.mxu1 %v1905_v35  ;;  %1250 = vmatprep.subr.bf16.mxu0 %v1906_v36  ;;  %v1996_v35 = vld [vmem:[%s2615_s1 + $0x200] ss:$8 sps:$4 sm:$0xff]  }
  0x30   : > { %1293 = vmatprep.subr.bf16.mxu1 %v1908_v37  ;;  %v1999_v36 = vld [vmem:[%s2615_s1 + $0x300] ss:$8 sps:$4 sm:$0xff]  }
  0x31   : > { %v2058_v37 = vld [vmem:[%s2285_s18 + $0x1c] ss:$36 sps:$4 sm:$0xff]  }
  0x32   : > { %1251 = vmatpush2.bf16.msra.mxu0 %v1910_v38  ;;  %v2004_v38 = vld [vmem:[%s2615_s1 + $0x2f4] ss:$8 sps:$4 sm:$0xff]  }
  0x33   : > { %1294 = vmatpush2.bf16.msra.mxu1 %v1911_v39  ;;  %1252 = vmatprep.subr.bf16.mxu0 %v1912_v40  ;;  %v2007_v39 = vld [vmem:[%s2615_s1 + $0x3f4] ss:$8 sps:$4 sm:$0xff]   ;;  %v2002_v40 = vld [vmem:[%s2615_s1 + $0x2f0] ss:$8 sps:$4 sm:$0xff]  }
  0x34   : > { %1295 = vmatprep.subr.bf16.mxu1 %v1914_v41  ;;  %v2005_v41 = vld [vmem:[%s2615_s1 + $0x3f0] ss:$8 sps:$4 sm:$0xff]  }
  0x36   : > { %1253 = vmatpush2.bf16.msra.mxu0 %v1916_v42  ;;  %v2010_v42 = vld [vmem:[%s2615_s1 + $0x2e4] ss:$8 sps:$4 sm:$0xff]  }
  0x37   : > { %1296 = vmatpush2.bf16.msra.mxu1 %v1917_v43  ;;  %1254 = vmatprep.subr.bf16.mxu0 %v1918_v44  ;;  %v2013_v43 = vld [vmem:[%s2615_s1 + $0x3e4] ss:$8 sps:$4 sm:$0xff]   ;;  %v2008_v44 = vld [vmem:[%s2615_s1 + $0x2e0] ss:$8 sps:$4 sm:$0xff]  }
  0x38   : > { %1297 = vmatprep.subr.bf16.mxu1 %v1920_v45  ;;  %v2011_v45 = vld [vmem:[%s2615_s1 + $0x3e0] ss:$8 sps:$4 sm:$0xff]  }
  0x3a   : > { %1255 = vmatpush2.bf16.msra.mxu0 %v1922_v46  ;;  %v2016_v46 = vld [vmem:[%s2615_s1 + $0x2d4] ss:$8 sps:$4 sm:$0xff]  }
  0x3b   : > { %1298 = vmatpush2.bf16.msra.mxu1 %v1923_v47  ;;  %1256 = vmatprep.subr.bf16.mxu0 %v1924_v48  ;;  %v2019_v47 = vld [vmem:[%s2615_s1 + $0x3d4] ss:$8 sps:$4 sm:$0xff]   ;;  %v2014_v48 = vld [vmem:[%s2615_s1 + $0x2d0] ss:$8 sps:$4 sm:$0xff]  }
  0x3c   : > { %1299 = vmatprep.subr.bf16.mxu1 %v1926_v50  ;;  %v2022_v50 = vld [vmem:[%s2615_s1 + $0x2c4] ss:$8 sps:$4 sm:$0xff]  }
  0x3e   : > { %1257 = vmatpush2.bf16.msra.mxu0 %v1928_v52  ;;  %v2020_v52 = vld [vmem:[%s2615_s1 + $0x2c0] ss:$8 sps:$4 sm:$0xff]  }
  0x3f   : > { %1300 = vmatpush2.bf16.msra.mxu1 %v1929_v53  ;;  %1258 = vmatprep.subr.bf16.mxu0 %v1930_v54  ;;  %v2023_v53 = vld [vmem:[%s2615_s1 + $0x3c0] ss:$8 sps:$4 sm:$0xff]   ;;  %v2028_v54 = vld [vmem:[%s2615_s1 + $0x2b4] ss:$8 sps:$4 sm:$0xff]  }
  0x40   : > { %1301 = vmatprep.subr.bf16.mxu1 %v1932_v55  ;;  %v2031_v55 = vld [vmem:[%s2615_s1 + $0x3b4] ss:$8 sps:$4 sm:$0xff]  }
  0x42   : > { %1259 = vmatpush2.bf16.msra.mxu0 %v1934_v56  ;;  %v2026_v56 = vld [vmem:[%s2615_s1 + $0x2b0] ss:$8 sps:$4 sm:$0xff]  }
  0x43   : > { %1302 = vmatpush2.bf16.msra.mxu1 %v1935_v57  ;;  %1260 = vmatprep.subr.bf16.mxu0 %v1936_v58  ;;  %v2029_v57 = vld [vmem:[%s2615_s1 + $0x3b0] ss:$8 sps:$4 sm:$0xff]   ;;  %v2034_v58 = vld [vmem:[%s2615_s1 + $0x2a4] ss:$8 sps:$4 sm:$0xff]  }
  0x44   : > { %1303 = vmatprep.subr.bf16.mxu1 %v1938_v59  ;;  %v2037_v59 = vld [vmem:[%s2615_s1 + $0x3a4] ss:$8 sps:$4 sm:$0xff]  }
  0x46   : > { %1261 = vmatpush2.bf16.msra.mxu0 %v1940_v60  ;;  %v2032_v60 = vld [vmem:[%s2615_s1 + $0x2a0] ss:$8 sps:$4 sm:$0xff]  }
  0x47   : > { %1304 = vmatpush2.bf16.msra.mxu1 %v1941_v61  ;;  %1262 = vmatprep.subr.bf16.mxu0 %v1942_v62  ;;  %v2035_v61 = vld [vmem:[%s2615_s1 + $0x3a0] ss:$8 sps:$4 sm:$0xff]   ;;  %v2040_v62 = vld [vmem:[%s2615_s1 + $0x294] ss:$8 sps:$4 sm:$0xff]  }
  0x48   : > { %1305 = vmatprep.subr.bf16.mxu1 %v1944_v63  ;;  %v2043_v63 = vld [vmem:[%s2615_s1 + $0x394] ss:$8 sps:$4 sm:$0xff]  }
  0x4a   : > { %1263 = vmatpush2.bf16.msra.mxu0 %v1946_v0  ;;  %v2038_v0 = vld [vmem:[%s2615_s1 + $0x290] ss:$8 sps:$4 sm:$0xff]  }
  0x4b   : > { %1306 = vmatpush2.bf16.msra.mxu1 %v1947_v1  ;;  %1318 = vmatprep.subr.bf16.mxu0 %v1956_v2  ;;  %v2041_v1 = vld [vmem:[%s2615_s1 + $0x390] ss:$8 sps:$4 sm:$0xff]   ;;  %v2046_v2 = vld [vmem:[%s2615_s1 + $0x284] ss:$8 sps:$4 sm:$0xff]  }
  0x4c   : > { %1361 = vmatprep.subr.bf16.mxu1 %v1959_v3  ;;  %v2049_v3 = vld [vmem:[%s2615_s1 + $0x384] ss:$8 sps:$4 sm:$0xff]  }
  0x4d   : > { %1265 = vmatmul.mubr.bf16.vlgmr.msra.gmra.mxu0 %v1948_v4  ;;  %v2044_v4 = vld [vmem:[%s2615_s1 + $0x280] ss:$8 sps:$4 sm:$0xff]  }
  0x4e   : > { %1308 = vmatmul.mubr.bf16.vlgmr.msra.gmra.mxu1 %v1951_v5  ;;  %1319 = vmatpush1.bf16.msra.mxu0 %v1954_v6  ;;  %v2047_v5 = vld [vmem:[%s2615_s1 + $0x380] ss:$8 sps:$4 sm:$0xff]   ;;  %v2055_v6 = vld [vmem:[%s2615_s1 + $0x474] ss:$8 sps:$4 sm:$0xff]  }
  0x4f   : > { %1362 = vmatpush1.bf16.msra.mxu1 %v1957_v7  ;;  %1320 = vmatprep.subr.bf16.mxu0 %v1962_v8  ;;  %v2050_v7 = vld [vmem:[%s2285_s18 + $0x10] ss:$36 sps:$4 sm:$0xff]   ;;  %v2056_v8 = vld [vmem:[%s2285_s18 + $0x18] ss:$36 sps:$4 sm:$0xff]  }
  0x50   : > { %1363 = vmatprep.subr.bf16.mxu1 %v1965_v9  ;;  %1350 = vmatprep.mubr.bf16.mxu0 %v2052_v34  ;;  %v2053_v9 = vld [vmem:[%s2615_s1 + $0x470] ss:$8 sps:$4 sm:$0xff]   ;;  %v1464_v34 = vlaneseq }
  0x51   : > { %1393 = vmatprep.mubr.bf16.mxu1 %v2058_v37 }
  0x52   : > { %1321 = vmatpush1.bf16.msra.mxu0 %v1960_v10  ;;  %v2061_v10 = vld [vmem:[%s2615_s1 + $0x464] ss:$8 sps:$4 sm:$0xff]  }
  0x53   : > { %1364 = vmatpush1.bf16.msra.mxu1 %v1963_v11  ;;  %1322 = vmatprep.subr.bf16.mxu0 %v1968_v12  ;;  %v2059_v11 = vld [vmem:[%s2615_s1 + $0x460] ss:$8 sps:$4 sm:$0xff]   ;;  %v2105_v12 = vmov 0  }
  0x54   : > { %1365 = vmatprep.subr.bf16.mxu1 %v1971_v13  ;;  %v2064_v13 = vld [vmem:[%s2615_s1 + $0x454] ss:$8 sps:$4 sm:$0xff]  }
  0x56   : > { %1323 = vmatpush1.bf16.msra.mxu0 %v1966_v14  ;;  %v2062_v14 = vld [vmem:[%s2615_s1 + $0x450] ss:$8 sps:$4 sm:$0xff]  }
  0x57   : > { %1366 = vmatpush1.bf16.msra.mxu1 %v1969_v15  ;;  %1324 = vmatprep.subr.bf16.mxu0 %v1974_v16  ;;  %v2067_v15 = vld [vmem:[%s2615_s1 + $0x444] ss:$8 sps:$4 sm:$0xff]   ;;  %v2065_v16 = vld [vmem:[%s2615_s1 + $0x440] ss:$8 sps:$4 sm:$0xff]  }
  0x58   : > { %1367 = vmatprep.subr.bf16.mxu1 %v1977_v17  ;;  %v2070_v17 = vld [vmem:[%s2615_s1 + $0x434] ss:$8 sps:$4 sm:$0xff]  }
  0x5a   : > { %1325 = vmatpush1.bf16.msra.mxu0 %v1972_v18  ;;  %v2068_v18 = vld [vmem:[%s2615_s1 + $0x430] ss:$8 sps:$4 sm:$0xff]  }
  0x5b   : > { %1368 = vmatpush1.bf16.msra.mxu1 %v1975_v19  ;;  %1326 = vmatprep.subr.bf16.mxu0 %v1980_v20  ;;  %v2073_v19 = vld [vmem:[%s2615_s1 + $0x424] ss:$8 sps:$4 sm:$0xff]   ;;  %v2071_v20 = vld [vmem:[%s2615_s1 + $0x420] ss:$8 sps:$4 sm:$0xff]  }
  0x5c   : > { %1369 = vmatprep.subr.bf16.mxu1 %v1983_v21  ;;  %v2076_v21 = vld [vmem:[%s2615_s1 + $0x414] ss:$8 sps:$4 sm:$0xff]  }
  0x5e   : > { %1327 = vmatpush1.bf16.msra.mxu0 %v1978_v22  ;;  %v2074_v22 = vld [vmem:[%s2615_s1 + $0x410] ss:$8 sps:$4 sm:$0xff]  }
  0x5f   : > { %1370 = vmatpush1.bf16.msra.mxu1 %v1981_v23  ;;  %1328 = vmatprep.subr.bf16.mxu0 %v1986_v24  ;;  %v2079_v23 = vld [vmem:[%s2615_s1 + $0x404] ss:$8 sps:$4 sm:$0xff]   ;;  %v2077_v24 = vld [vmem:[%s2615_s1 + $0x400] ss:$8 sps:$4 sm:$0xff]  }
  0x60   : > { %1371 = vmatprep.subr.bf16.mxu1 %v1989_v25  ;;  %v2080_v25 = vld [vmem:[%s2285_s18 + $0x20] ss:$36 sps:$4 sm:$0xff]  }
  0x62   : > { %1329 = vmatpush1.bf16.msra.mxu0 %v1984_v26 }
  0x63   : > { %1372 = vmatpush1.bf16.msra.mxu1 %v1987_v27  ;;  %1330 = vmatprep.subr.bf16.mxu0 %v1992_v28 }
  0x64   : > { %1373 = vmatprep.subr.bf16.mxu1 %v1995_v29 }
  0x66   : > { %1331 = vmatpush1.bf16.msra.mxu0 %v1990_v30 }
  0x67   : > { %1374 = vmatpush1.bf16.msra.mxu1 %v1993_v31  ;;  %1332 = vmatprep.subr.bf16.mxu0 %v1998_v32 }
  0x68   : > { %1375 = vmatprep.subr.bf16.mxu1 %v2001_v33 }
  0x6a   : > { %1333 = vmatpush1.bf16.msra.mxu0 %v1996_v35 }
  0x6b   : > { %1376 = vmatpush1.bf16.msra.mxu1 %v1999_v36  ;;  %1334 = vmatprep.subr.bf16.mxu0 %v2004_v38  ;;  %v1465_v38 = vshrl.u32 %v1464_v34, 7 }
  0x6c   : > { %1377 = vmatprep.subr.bf16.mxu1 %v2007_v39 }
  0x6e   : > { %1335 = vmatpush2.bf16.msra.mxu0 %v2002_v40 }
  0x6f   : > { %1378 = vmatpush2.bf16.msra.mxu1 %v2005_v41  ;;  %1336 = vmatprep.subr.bf16.mxu0 %v2010_v42 }
  0x70   : > { %1379 = vmatprep.subr.bf16.mxu1 %v2013_v43 }
  0x72   : > { %1337 = vmatpush2.bf16.msra.mxu0 %v2008_v44  ;;  %v1466_v44 = vsub.s32 0, %v1465_v38 }
  0x73   : > { %1380 = vmatpush2.bf16.msra.mxu1 %v2011_v45  ;;  %1338 = vmatprep.subr.bf16.mxu0 %v2016_v46  ;;  %v1462_v45 = vld [vmem:[%s2616_s2] sm:$0x3] }
  0x74   : > { %1381 = vmatprep.subr.bf16.mxu1 %v2019_v47 }
  0x76   : > { %1339 = vmatpush2.bf16.msra.mxu0 %v2014_v48  ;;  %v1470_v48 = vsub.s32 1, %v1465_v38 }
  0x77   : > { %1382 = vmatpush2.bf16.msra.mxu1 %v2017_v49  ;;  %1340 = vmatprep.subr.bf16.mxu0 %v2022_v50 }
  0x78   : > { %1383 = vmatprep.subr.bf16.mxu1 %v2025_v51 }
  0x7a   : > { %1341 = vmatpush2.bf16.msra.mxu0 %v2020_v52 }
  0x7b   : > { %1384 = vmatpush2.bf16.msra.mxu1 %v2023_v53  ;;  %1342 = vmatprep.subr.bf16.mxu0 %v2028_v54  ;;  %v1467_v54 = vrot.slane %v1462_v45, %v1466_v44 }
  0x7c   : > { %1385 = vmatprep.subr.bf16.mxu1 %v2031_v55 }
  0x7e   : > { %1343 = vmatpush2.bf16.msra.mxu0 %v2026_v56 }
  0x7f   : > { %1386 = vmatpush2.bf16.msra.mxu1 %v2029_v57  ;;  %1344 = vmatprep.subr.bf16.mxu0 %v2034_v58 }
  0x80   : > { %1387 = vmatprep.subr.bf16.mxu1 %v2037_v59  ;;  %v1471_v59 = vrot.slane %v1462_v45, %v1470_v48 }
  0x82   : > { %1345 = vmatpush2.bf16.msra.mxu0 %v2032_v60 }
  0x83   : > { %1388 = vmatpush2.bf16.msra.mxu1 %v2035_v61  ;;  %1346 = vmatprep.subr.bf16.mxu0 %v2040_v62 }
  0x84   : > { %1389 = vmatprep.subr.bf16.mxu1 %v2043_v63 }
  0x86   : > { %1347 = vmatpush2.bf16.msra.mxu0 %v2038_v0 }
  0x87   : > { %1390 = vmatpush2.bf16.msra.mxu1 %v2041_v1  ;;  %1348 = vmatprep.subr.bf16.mxu0 %v2046_v2 }
  0x88   : > { %1391 = vmatprep.subr.bf16.mxu1 %v2049_v3 }
  0x8a   : > { %1349 = vmatpush2.bf16.msra.mxu0 %v2044_v4 }
  0x8b   : > { %1392 = vmatpush2.bf16.msra.mxu1 %v2047_v5  ;;  %1404 = vmatprep.subr.bf16.mxu0 %v2055_v6 }
  0x8d   : > { %1351 = vmatmul.mubr.bf16.vlgmr.msra.gmra.mxu0 %v2050_v7 }
  0x8e   : > { %1394 = vmatmul.mubr.bf16.vlgmr.msra.gmra.mxu1 %v2056_v8  ;;  %1405 = vmatpush1.bf16.msra.mxu0 %v2053_v9 }
  0x8f   : > { %1436 = vmatprep.mubr.bf16.mxu0 %v2105_v12  ;;  %1406 = vmatprep.subr.bf16.mxu0 %v2061_v10 }
  0x92   : > { %1407 = vmatpush1.bf16.msra.mxu0 %v2059_v11 }
  0x93   : > { %1408 = vmatprep.subr.bf16.mxu0 %v2064_v13 }
  0x96   : > { %1409 = vmatpush1.bf16.msra.mxu0 %v2062_v14 }
  0x97   : > { %1410 = vmatprep.subr.bf16.mxu0 %v2067_v15 }
  0x9a   : > { %1411 = vmatpush1.bf16.msra.mxu0 %v2065_v16 }
  0x9b   : > { %1412 = vmatprep.subr.bf16.mxu0 %v2070_v17 }
  0x9e   : > { %1413 = vmatpush1.bf16.msra.mxu0 %v2068_v18 }
  0x9f   : > { %1414 = vmatprep.subr.bf16.mxu0 %v2073_v19 }
  0xa2   : > { %1415 = vmatpush1.bf16.msra.mxu0 %v2071_v20 }
  0xa3   : > { %1416 = vmatprep.subr.bf16.mxu0 %v2076_v21 }
  0xa6   : > { %1417 = vmatpush1.bf16.msra.mxu0 %v2074_v22 }
  0xa7   : > { %1418 = vmatprep.subr.bf16.mxu0 %v2079_v23 }
  0xaa   : > { %1419 = vmatpush1.bf16.msra.mxu0 %v2077_v24 }
  0xad   : > { %1437 = vmatmul.mubr.bf16.vlgmr.msra.gmra.mxu0 %v2080_v25 }
 0x10d   : > { %v1266_v26 = vpop.f32.mrf.mxu0 }
 0x10e   : > { %v1309_v27 = vpop.f32.mrf.mxu1 }
 0x10f   : > { %v1268_v28 = vpop.f32.mrf.mxu0  ;;  %v1310_v39 = vadd.f32 %v1309_v27, %v1266_v26 }
 0x110   : > { %v1311_v29 = vpop.f32.mrf.mxu1 }
 0x111   : > { %v1270_v30 = vpop.f32.mrf.mxu0  ;;  %v1312_v42 = vadd.f32 %v1311_v29, %v1268_v28 }
 0x112   : > { %v1313_v31 = vpop.f32.mrf.mxu1 }
 0x113   : > { %v1272_v32 = vpop.f32.mrf.mxu0  ;;  %v1314_v46 = vadd.f32 %v1313_v31, %v1270_v30 }
 0x114   : > { %v1315_v35 = vpop.f32.mrf.mxu1 }
 0x115   : > { %v1316_v51 = vadd.f32 %v1315_v35, %v1272_v32 }
 0x14d   : > { %v1352_v33 = vpop.f32.mrf.mxu0 }
 0x14e   : > { %v1395_v37 = vpop.f32.mrf.mxu1  ;;  %v1353_v43 = vadd.f32 %v1352_v33, %v1310_v39 }
 0x14f   : > { %v1354_v36 = vpop.f32.mrf.mxu0 }
 0x150   : > { %v1397_v41 = vpop.f32.mrf.mxu1  ;;  %v1355_v47 = vadd.f32 %v1354_v36, %v1312_v42  ;;  %v1396_v52 = vadd.f32 %v1395_v37, %v1353_v43 }
 0x151   : > { %v1356_v40 = vpop.f32.mrf.mxu0 }
 0x152   : > { %v1399_v50 = vpop.f32.mrf.mxu1  ;;  %v1357_v53 = vadd.f32 %v1356_v40, %v1314_v46  ;;  %v1398_v56 = vadd.f32 %v1397_v41, %v1355_v47 }
 0x153   : > { %v1358_v49 = vpop.f32.mrf.mxu0 }
 0x154   : > { %v1359_v57 = vadd.f32 %v1358_v49, %v1316_v51  ;;  %v1401_v60 = vpop.f32.mrf.mxu1  ;;  %v1400_v62 = vadd.f32 %v1399_v50, %v1357_v53 }
 0x156   : > { %v1402_v2 = vadd.f32 %v1401_v60, %v1359_v57 }
 0x16d   : > { %v1438_v55 = vpop.f32.mrf.mxu0 }
 0x16e   : > { %v1439_v58 = vadd.f32 %v1438_v55, %v1396_v52 }
 0x16f   : > { %v1440_v61 = vpop.f32.mrf.mxu0 }
 0x170   : > { %v1474_v63 = vadd.f32 %v1467_v54, %v1439_v58  ;;  %v1441_v0 = vadd.f32 %v1440_v61, %v1398_v56 }
 0x171   : > { %v1442_v1 = vpop.f32.mrf.mxu0 }
 0x172   : > { %v1478_v3 = vmax.f32 %v1474_v63, 0.0  ;;  %v1475_v4 = vadd.f32 %v1471_v59, %v1441_v0  ;;  %v1443_v5 = vadd.f32 %v1442_v1, %v1400_v62 }
 0x173   : > { %v1444_v6 = vpop.f32.mrf.mxu0 }
 0x174   : > { %v1479_v7 = vmax.f32 %v1475_v4, 0.0  ;;  %v1476_v8 = vadd.f32 %v1467_v54, %v1443_v5  ;;  %v1445_v9 = vadd.f32 %v1444_v6, %v1402_v2  ;;  %1485 = sbr.rel (%p1815_p5) target bundleno = 379 (0x17b), region = 44 }
 0x176   : > { %v1480_v10 = vmax.f32 %v1476_v8, 0.0  ;;  %v1477_v11 = vadd.f32 %v1471_v59, %v1445_v9 }
 0x178   : > { %v1481_v12 = vmax.f32 %v1477_v11, 0.0 }
 0x179   : > { %1486 = vst [vmem:[#allocation3 + $0x10] sm:$0xff] %v1478_v3  ;;  %1487 = vst [vmem:[#allocation3] sm:$0xff] %v1479_v7 }
 0x17a   : > { %1488 = vst [vmem:[#allocation3 + $0x18] sm:$0xff] %v1480_v10  ;;  %1489 = vst [vmem:[#allocation3 + $0x8] sm:$0xff] %v1481_v12 }
 0x17b PF: > { %p1816_p6 = scmp.le.s32.totalorder %s2095_s12, 0 }
 0x17d   : > { %1493 = sbr.rel (%p1816_p6) target bundleno = 391 (0x187), region = 48 }
 0x182   : > { %v1494_v13 = vld [vmem:[#allocation3 + $0x10] sm:$0xff]  ;;  %v1495_v14 = vld [vmem:[#allocation3] sm:$0xff]  ;;  %v1496_v15 = vld [vmem:[#allocation3 + $0x18] sm:$0xff] }
 0x183   : > { %v1498_v16 = vmax.f32 %v1494_v13, %v1478_v3  ;;  %v1499_v17 = vmax.f32 %v1495_v14, %v1479_v7  ;;  %v1500_v18 = vmax.f32 %v1496_v15, %v1480_v10  ;;  %v1497_v19 = vld [vmem:[#allocation3 + $0x8] sm:$0xff] }
 0x184   : > { %v1501_v20 = vmax.f32 %v1497_v19, %v1481_v12 }
 0x185   : > { %1502 = vst [vmem:[#allocation3 + $0x10] sm:$0xff] %v1498_v16  ;;  %1503 = vst [vmem:[#allocation3] sm:$0xff] %v1499_v17 }
 0x186   : > { %1504 = vst [vmem:[#allocation3 + $0x18] sm:$0xff] %v1500_v18  ;;  %1505 = vst [vmem:[#allocation3 + $0x8] sm:$0xff] %v1501_v20 }
 0x187 PF: > { %p1817_p7 = scmp.ne.s32.totalorder %s2095_s12, 3 }
 0x189   : > { %1509 = sbr.rel (%p1817_p7) target bundleno = 403 (0x193), region = 52 }
 0x18e   : > { %v1510_v21 = vld [vmem:[#allocation3 + $0x10] sm:$0xff]  ;;  %v1511_v22 = vld [vmem:[#allocation3] sm:$0xff]  ;;  %v1512_v23 = vld [vmem:[#allocation3 + $0x18] sm:$0xff] }
 0x18f   : > { %v1824_v24 = vpack.c.bf16 %v1511_v22, %v1510_v21  ;;  %v1513_v25 = vld [vmem:[#allocation3 + $0x8] sm:$0xff] }
 0x190   : > { %v1825_v26 = vpack.c.bf16 %v1513_v25, %v1512_v23 }
 0x191   : > { %1526 = vst [vmem:[%s2617_s3] sm:$0xff] %v1824_v24 }
 0x192   : > { %1527 = vst [vmem:[%s2617_s3 + $0x8] sm:$0xff] %v1825_v26 }
 0x193 PF: > { %s13_s14 = sadd.s32 1, %s2103_s14   ;;  %s2618_s12 = smov %s2099_s13 }
 0x194   : > { %p10_p8 = scmp.ge.s32.totalorder %s13_s14, 6   ;;  %s2619_s13 = smov %s2621_s15 }
 0x196   :  { %12 = sbr.rel (!%p10_p8) target bundleno = 2 (0x2), region = 88 }

// kernel: ppo_forward.8
= control target key start
LH: loop header
LB: loop body
LE: loop exit
PB: predicated region body
PF: predicated region fallthrough
CT: control target
= control target key end

     0   :  { %s1309_s1 = inlined_call_operand.vmem [shape: bf16[1024,128], index: 1, kind: input, shape index: {}]   ;;  %s1310_s0 = inlined_call_operand.vmem [shape: bf16[16,1024], index: 0, kind: input, shape index: {}]   ;;  %s1311_s2 = inlined_call_operand.vmem [shape: f32[1,128], index: 2, kind: input, shape index: {}]   ;;  %s1312_s3 = inlined_call_operand.vmem [shape: bf16[16,128], index: 3, kind: output, shape index: {}]  }
   0x1   :  { %v1003_v0 = vld [vmem:[%s1309_s1 + $0x78] sm:$0xff]   ;;  %v1007_v4 = vld [vmem:[%s1309_s1 + $0x70] sm:$0xff]   ;;  %v1011_v8 = vld [vmem:[%s1309_s1 + $0x68] sm:$0xff]  }
   0x2   :  { %v1004_v1 = vld [vmem:[%s1309_s1 + $0xf8] sm:$0xff]   ;;  %915 = vmatprep.subr.bf16.mxu0 %v1003_v0  ;;  %v1008_v5 = vld [vmem:[%s1309_s1 + $0xf0] sm:$0xff]   ;;  %v1012_v9 = vld [vmem:[%s1309_s1 + $0xe8] sm:$0xff]  }
   0x3   :  { %v1005_v2 = vld [vmem:[%s1309_s1 + $0x38] sm:$0xff]   ;;  %937 = vmatprep.subr.bf16.mxu1 %v1004_v1  ;;  %v1009_v6 = vld [vmem:[%s1309_s1 + $0x30] sm:$0xff]   ;;  %v1013_v10 = vld [vmem:[%s1309_s1 + $0x28] sm:$0xff]  }
   0x4   :  { %v1006_v3 = vld [vmem:[%s1309_s1 + $0xb8] sm:$0xff]   ;;  %916 = vmatpush3.bf16.msra.mxu0 %v1005_v2  ;;  %v1010_v7 = vld [vmem:[%s1309_s1 + $0xb0] sm:$0xff]   ;;  %v1014_v11 = vld [vmem:[%s1309_s1 + $0xa8] sm:$0xff]  }
   0x5   :  { %938 = vmatpush3.bf16.msra.mxu1 %v1006_v3  ;;  %917 = vmatprep.subr.bf16.mxu0 %v1007_v4  ;;  %v1015_v12 = vld [vmem:[%s1309_s1 + $0x60] sm:$0xff]   ;;  %v1019_v16 = vld [vmem:[%s1309_s1 + $0x58] sm:$0xff]   ;;  %v1023_v20 = vld [vmem:[%s1309_s1 + $0x50] sm:$0xff]  }
   0x6   :  { %939 = vmatprep.subr.bf16.mxu1 %v1008_v5  ;;  %v1016_v13 = vld [vmem:[%s1309_s1 + $0xe0] sm:$0xff]   ;;  %v1020_v17 = vld [vmem:[%s1309_s1 + $0xd8] sm:$0xff]   ;;  %v1024_v21 = vld [vmem:[%s1309_s1 + $0xd0] sm:$0xff]  }
   0x7   :  { %v1017_v14 = vld [vmem:[%s1309_s1 + $0x20] sm:$0xff]   ;;  %v1021_v18 = vld [vmem:[%s1309_s1 + $0x18] sm:$0xff]   ;;  %v1025_v22 = vld [vmem:[%s1309_s1 + $0x10] sm:$0xff]  }
   0x8   :  { %918 = vmatpush3.bf16.msra.mxu0 %v1009_v6  ;;  %v1018_v15 = vld [vmem:[%s1309_s1 + $0xa0] sm:$0xff]   ;;  %v1022_v19 = vld [vmem:[%s1309_s1 + $0x98] sm:$0xff]   ;;  %v1026_v23 = vld [vmem:[%s1309_s1 + $0x90] sm:$0xff]  }
   0x9   :  { %940 = vmatpush3.bf16.msra.mxu1 %v1010_v7  ;;  %919 = vmatprep.subr.bf16.mxu0 %v1011_v8  ;;  %v1027_v24 = vld [vmem:[%s1309_s1 + $0x48] sm:$0xff]   ;;  %v1031_v28 = vld [vmem:[%s1309_s1 + $0x40] sm:$0xff]   ;;  %v1035_v40 = vld [vmem:[%s1309_s1 + $0x178] sm:$0xff]  }
   0xa   :  { %941 = vmatprep.subr.bf16.mxu1 %v1012_v9  ;;  %v1028_v25 = vld [vmem:[%s1309_s1 + $0xc8] sm:$0xff]   ;;  %v1032_v29 = vld [vmem:[%s1309_s1 + $0xc0] sm:$0xff]   ;;  %v1036_v41 = vld [vmem:[%s1309_s1 + $0x1f8] sm:$0xff]  }
   0xb   :  { %v1029_v26 = vld [vmem:[%s1309_s1 + $0x8] sm:$0xff]   ;;  %v1033_v30 = vld [vmem:[%s1309_s1] sm:$0xff]   ;;  %v1037_v42 = vld [vmem:[%s1309_s1 + $0x138] sm:$0xff]  }
   0xc   :  { %920 = vmatpush3.bf16.msra.mxu0 %v1013_v10  ;;  %v1030_v27 = vld [vmem:[%s1309_s1 + $0x88] sm:$0xff]   ;;  %v1034_v31 = vld [vmem:[%s1309_s1 + $0x80] sm:$0xff]   ;;  %v1038_v43 = vld [vmem:[%s1309_s1 + $0x1b8] sm:$0xff]  }
   0xd   :  { %942 = vmatpush3.bf16.msra.mxu1 %v1014_v11  ;;  %921 = vmatprep.subr.bf16.mxu0 %v1015_v12  ;;  %v48_v32 = vld [vmem:[%s1310_s0] sm:$0xff]  ;;  %v49_v34 = vld [vmem:[%s1310_s0 + $0x8] sm:$0xff]  ;;  %v1039_v44 = vld [vmem:[%s1309_s1 + $0x170] sm:$0xff]  }
   0xe   :  { %943 = vmatprep.subr.bf16.mxu1 %v1016_v13  ;;  %v52_v33 = vld [vmem:[%s1310_s0 + $0x20] sm:$0xff]  ;;  %v53_v37 = vld [vmem:[%s1310_s0 + $0x28] sm:$0xff]  ;;  %v1040_v45 = vld [vmem:[%s1309_s1 + $0x1f0] sm:$0xff]  }
   0xf   :  { %v833_v35 = vcombine.low %v48_v32, %v52_v33  ;;  %v834_v36 = vcombine.high %v48_v32, %v52_v33  ;;  %v835_v38 = vcombine.low %v49_v34, %v53_v37  ;;  %v836_v39 = vcombine.high %v49_v34, %v53_v37  ;;  %v1041_v46 = vld [vmem:[%s1309_s1 + $0x130] sm:$0xff]   ;;  %v1043_v48 = vld [vmem:[%s1309_s1 + $0x168] sm:$0xff]   ;;  %v1047_v52 = vld [vmem:[%s1309_s1 + $0x160] sm:$0xff]  }
  0x10   :  { %922 = vmatpush3.bf16.msra.mxu0 %v1017_v14  ;;  %v1042_v47 = vld [vmem:[%s1309_s1 + $0x1b0] sm:$0xff]   ;;  %v1044_v49 = vld [vmem:[%s1309_s1 + $0x1e8] sm:$0xff]   ;;  %v1048_v53 = vld [vmem:[%s1309_s1 + $0x1e0] sm:$0xff]  }
  0x11   :  { %944 = vmatpush3.bf16.msra.mxu1 %v1018_v15  ;;  %923 = vmatprep.subr.bf16.mxu0 %v1019_v16  ;;  %v1045_v50 = vld [vmem:[%s1309_s1 + $0x128] sm:$0xff]   ;;  %v1049_v54 = vld [vmem:[%s1309_s1 + $0x120] sm:$0xff]   ;;  %v1051_v56 = vld [vmem:[%s1309_s1 + $0x158] sm:$0xff]  }
  0x12   :  { %945 = vmatprep.subr.bf16.mxu1 %v1020_v17  ;;  %640 = vmatprep.mubr.bf16.mxu0 %v834_v36  ;;  %v1046_v51 = vld [vmem:[%s1309_s1 + $0x1a8] sm:$0xff]   ;;  %v1050_v55 = vld [vmem:[%s1309_s1 + $0x1a0] sm:$0xff]   ;;  %v1052_v57 = vld [vmem:[%s1309_s1 + $0x1d8] sm:$0xff]  }
  0x13   :  { %681 = vmatprep.mubr.bf16.mxu1 %v836_v39  ;;  %v1053_v58 = vld [vmem:[%s1309_s1 + $0x118] sm:$0xff]   ;;  %v1055_v60 = vld [vmem:[%s1309_s1 + $0x150] sm:$0xff]   ;;  %v1059_v0 = vld [vmem:[%s1309_s1 + $0x148] sm:$0xff]  }
  0x14   :  { %924 = vmatpush3.bf16.msra.mxu0 %v1021_v18  ;;  %v1054_v59 = vld [vmem:[%s1309_s1 + $0x198] sm:$0xff]   ;;  %v1056_v61 = vld [vmem:[%s1309_s1 + $0x1d0] sm:$0xff]   ;;  %v1060_v1 = vld [vmem:[%s1309_s1 + $0x1c8] sm:$0xff]  }
  0x15   :  { %946 = vmatpush3.bf16.msra.mxu1 %v1022_v19  ;;  %925 = vmatprep.subr.bf16.mxu0 %v1023_v20  ;;  %v1057_v62 = vld [vmem:[%s1309_s1 + $0x110] sm:$0xff]   ;;  %v1061_v2 = vld [vmem:[%s1309_s1 + $0x108] sm:$0xff]   ;;  %v1063_v4 = vld [vmem:[%s1309_s1 + $0x140] sm:$0xff]  }
  0x16   :  { %947 = vmatprep.subr.bf16.mxu1 %v1024_v21  ;;  %v1058_v63 = vld [vmem:[%s1309_s1 + $0x190] sm:$0xff]   ;;  %v1062_v3 = vld [vmem:[%s1309_s1 + $0x188] sm:$0xff]   ;;  %v1064_v5 = vld [vmem:[%s1309_s1 + $0x1c0] sm:$0xff]  }
  0x17   :  { %v1065_v6 = vld [vmem:[%s1309_s1 + $0x100] sm:$0xff]   ;;  %v50_v8 = vld [vmem:[%s1310_s0 + $0x10] sm:$0xff]  ;;  %v51_v12 = vld [vmem:[%s1310_s0 + $0x18] sm:$0xff] }
  0x18   :  { %926 = vmatpush3.bf16.msra.mxu0 %v1025_v22  ;;  %v1066_v7 = vld [vmem:[%s1309_s1 + $0x180] sm:$0xff]   ;;  %v54_v9 = vld [vmem:[%s1310_s0 + $0x30] sm:$0xff]  ;;  %v55_v13 = vld [vmem:[%s1310_s0 + $0x38] sm:$0xff] }
  0x19   :  { %948 = vmatpush3.bf16.msra.mxu1 %v1026_v23  ;;  %927 = vmatprep.subr.bf16.mxu0 %v1027_v24  ;;  %v837_v10 = vcombine.low %v50_v8, %v54_v9  ;;  %v838_v11 = vcombine.high %v50_v8, %v54_v9  ;;  %v839_v14 = vcombine.low %v51_v12, %v55_v13 }
  0x1a   :  { %949 = vmatprep.subr.bf16.mxu1 %v1028_v25  ;;  %v840_v15 = vcombine.high %v51_v12, %v55_v13 }
  0x1c   :  { %928 = vmatpush3.bf16.msra.mxu0 %v1029_v26 }
  0x1d   :  { %950 = vmatpush3.bf16.msra.mxu1 %v1030_v27  ;;  %929 = vmatprep.subr.bf16.mxu0 %v1031_v28 }
  0x1e   :  { %951 = vmatprep.subr.bf16.mxu1 %v1032_v29 }
  0x20   :  { %930 = vmatpush3.bf16.msra.mxu0 %v1033_v30 }
  0x21   :  { %952 = vmatpush3.bf16.msra.mxu1 %v1034_v31  ;;  %959 = vmatprep.subr.bf16.mxu0 %v1035_v40 }
  0x22   :  { %981 = vmatprep.subr.bf16.mxu1 %v1036_v41 }
  0x23   :  { %641 = vmatmul.mubr.bf16.vlgmr.msra.gmra.mxu0 %v833_v35 }
  0x24   :  { %682 = vmatmul.mubr.bf16.vlgmr.msra.gmra.mxu1 %v835_v38  ;;  %960 = vmatpush3.bf16.msra.mxu0 %v1037_v42 }
  0x25   :  { %982 = vmatpush3.bf16.msra.mxu1 %v1038_v43  ;;  %961 = vmatprep.subr.bf16.mxu0 %v1039_v44  ;;  %v905_v43 = vld [vmem:[%s1311_s2] ss:$0 sm:$0xff] }
  0x26   :  { %983 = vmatprep.subr.bf16.mxu1 %v1040_v45  ;;  %722 = vmatprep.mubr.bf16.mxu0 %v838_v11 }
  0x27   :  { %763 = vmatprep.mubr.bf16.mxu1 %v840_v15 }
  0x28   :  { %962 = vmatpush3.bf16.msra.mxu0 %v1041_v46 }
  0x29   :  { %984 = vmatpush3.bf16.msra.mxu1 %v1042_v47  ;;  %963 = vmatprep.subr.bf16.mxu0 %v1043_v48 }
  0x2a   :  { %985 = vmatprep.subr.bf16.mxu1 %v1044_v49 }
  0x2c   :  { %964 = vmatpush3.bf16.msra.mxu0 %v1045_v50 }
  0x2d   :  { %986 = vmatpush3.bf16.msra.mxu1 %v1046_v51  ;;  %965 = vmatprep.subr.bf16.mxu0 %v1047_v52 }
  0x2e   :  { %987 = vmatprep.subr.bf16.mxu1 %v1048_v53 }
  0x30   :  { %966 = vmatpush3.bf16.msra.mxu0 %v1049_v54 }
  0x31   :  { %988 = vmatpush3.bf16.msra.mxu1 %v1050_v55  ;;  %967 = vmatprep.subr.bf16.mxu0 %v1051_v56 }
  0x32   :  { %989 = vmatprep.subr.bf16.mxu1 %v1052_v57 }
  0x34   :  { %968 = vmatpush3.bf16.msra.mxu0 %v1053_v58 }
  0x35   :  { %990 = vmatpush3.bf16.msra.mxu1 %v1054_v59  ;;  %969 = vmatprep.subr.bf16.mxu0 %v1055_v60 }
  0x36   :  { %991 = vmatprep.subr.bf16.mxu1 %v1056_v61 }
  0x38   :  { %970 = vmatpush3.bf16.msra.mxu0 %v1057_v62 }
  0x39   :  { %992 = vmatpush3.bf16.msra.mxu1 %v1058_v63  ;;  %971 = vmatprep.subr.bf16.mxu0 %v1059_v0 }
  0x3a   :  { %993 = vmatprep.subr.bf16.mxu1 %v1060_v1 }
  0x3c   :  { %972 = vmatpush3.bf16.msra.mxu0 %v1061_v2 }
  0x3d   :  { %994 = vmatpush3.bf16.msra.mxu1 %v1062_v3  ;;  %973 = vmatprep.subr.bf16.mxu0 %v1063_v4 }
  0x3e   :  { %995 = vmatprep.subr.bf16.mxu1 %v1064_v5 }
  0x40   :  { %974 = vmatpush3.bf16.msra.mxu0 %v1065_v6 }
  0x41   :  { %996 = vmatpush3.bf16.msra.mxu1 %v1066_v7 }
  0x43   :  { %723 = vmatmul.mubr.bf16.vlgmr.msra.gmra.mxu0 %v837_v10 }
  0x44   :  { %764 = vmatmul.mubr.bf16.vlgmr.msra.gmra.mxu1 %v839_v14 }
  0xe3   :  { %v931_v16 = vpop.f32.mrf.mxu0 }
  0xe4   :  { %v953_v17 = vpop.f32.mrf.mxu1 }
  0xe5   :  { %v932_v18 = vpop.f32.mrf.mxu0 }
  0xe6   :  { %v954_v19 = vpop.f32.mrf.mxu1  ;;  %v933_v23 = vadd.f32 %v932_v18, %v931_v16 }
  0xe7   :  { %v934_v20 = vpop.f32.mrf.mxu0  ;;  %v955_v24 = vadd.f32 %v954_v19, %v953_v17 }
  0xe8   :  { %v956_v21 = vpop.f32.mrf.mxu1 }
  0xe9   :  { %v935_v22 = vpop.f32.mrf.mxu0  ;;  %v684_v29 = vadd.f32 %v955_v24, %v933_v23 }
  0xea   :  { %v957_v25 = vpop.f32.mrf.mxu1  ;;  %v936_v30 = vadd.f32 %v935_v22, %v934_v20 }
  0xeb   :  { %v958_v31 = vadd.f32 %v957_v25, %v956_v21 }
  0xed   :  { %v687_v39 = vadd.f32 %v958_v31, %v936_v30 }
 0x103   :  { %v975_v26 = vpop.f32.mrf.mxu0 }
 0x104   :  { %v997_v27 = vpop.f32.mrf.mxu1 }
 0x105   :  { %v976_v28 = vpop.f32.mrf.mxu0 }
 0x106   :  { %v977_v32 = vadd.f32 %v976_v28, %v975_v26  ;;  %v998_v33 = vpop.f32.mrf.mxu1 }
 0x107   :  { %v978_v34 = vpop.f32.mrf.mxu0  ;;  %v999_v36 = vadd.f32 %v998_v33, %v997_v27 }
 0x108   :  { %v725_v35 = vadd.f32 %v977_v32, %v684_v29  ;;  %v1000_v37 = vpop.f32.mrf.mxu1 }
 0x109   :  { %v979_v38 = vpop.f32.mrf.mxu0 }
 0x10a   :  { %v766_v40 = vadd.f32 %v999_v36, %v725_v35  ;;  %v980_v41 = vadd.f32 %v979_v38, %v978_v34  ;;  %v1001_v42 = vpop.f32.mrf.mxu1 }
 0x10b   :  { %v1002_v45 = vadd.f32 %v1001_v42, %v1000_v37 }
 0x10c   :  { %v728_v44 = vadd.f32 %v980_v41, %v687_v39  ;;  %v788_v46 = vadd.f32 %v905_v43, %v766_v40 }
 0x10e   :  { %v769_v47 = vadd.f32 %v1002_v45, %v728_v44  ;;  %v790_v49 = vmax.f32 %v788_v46, 0.0 }
 0x110   :  { %v789_v48 = vadd.f32 %v905_v43, %v769_v47 }
 0x112   :  { %v791_v50 = vmax.f32 %v789_v48, 0.0 }
 0x114   :  { %v913_v51 = vpack.c.bf16 %v791_v50, %v790_v49 }
 0x116   :  { %914 = vst [vmem:[%s1312_s3] sm:$0xff] %v913_v51  }

</bundles_post_ra>
